<compile_context>
chip_gen: v5e
topology: v5e:2x2
jax: 0.10.0
libtpu: 0.0.40
codegen_flags: <defaults>
</compile_context>

<pallas_src>
import jax
import jax.numpy as jnp
from jax import lax
from jax.experimental import pallas as pl
from jax.experimental.pallas import tpu as pltpu

KSIZE = 3
PAD = (KSIZE - 1) // 2


def rdb_conv_kernel(xm_ref, xh0_ref, xh1_ref, w_ref, b_ref, o_ref, win_ref, patch_ref):
    """One (batch, row-tile) grid step.

    xm_ref   : (1, TH, W+2p, Cin)   main padded-input rows of this tile
    xh0_ref  : (1, 1,  W+2p, Cin)   first halo row below the tile
    xh1_ref  : (1, 1,  W+2p, Cin)   second halo row below the tile
    w_ref    : (9*Cin, G)           conv weights, im2col layout (ky, kx, cin) x G
    b_ref    : (1, G)               bias
    o_ref    : (1, TH, W, G)        relu(conv + b) tile (concat with x happens wrapper-side)
    win_ref  : VMEM (TH+2p, W+2p, Cin) scratch: assembled halo window
    patch_ref: VMEM (TH*W, 9*Cin)      scratch: im2col patch matrix
    """
    TH, W, G = o_ref.shape[1], o_ref.shape[2], o_ref.shape[3]
    Cin = xm_ref.shape[3]

    # Assemble the (TH+2, W+2, Cin) window with 3 row-range stores (no concat op needed).
    win_ref[:TH] = xm_ref[0]
    win_ref[TH:TH + 1] = xh0_ref[0]
    win_ref[TH + 1:TH + 2] = xh1_ref[0]

    # im2col: write each of the 9 taps into its K-slice of the patch matrix.
    for dy in range(KSIZE):
        for dx in range(KSIZE):
            k = dy * KSIZE + dx
            tap = win_ref[dy:dy + TH, dx:dx + W, :]               # (TH, W, Cin)
            patch_ref[:, k * Cin:(k + 1) * Cin] = tap.reshape(TH * W, Cin)

    # Single fused MXU matmul with K = 9*Cin, f32 accumulation.
    # (For very large Cin on v5e one could split K into accumulating chunks.)
    acc = jnp.dot(patch_ref[...].astype(jnp.float32),
                  w_ref[...],
                  preferred_element_type=jnp.float32)
    acc = acc + b_ref[...]                                        # (1, G) broadcast add
    out = jnp.maximum(acc, 0.0).reshape(1, TH, W, G)
    o_ref[...] = out.astype(o_ref.dtype)                          # one full-block store


def rdb_conv(x_nchw, weight_hwio, bias, *, width_mult=1.0, tile_h=None, interpret=False):
    """x_nchw: (B, Cin, H, W).  weight_hwio: (3, 3, Cin, G).  bias: (G,).
    Returns (B, Cin + G_active, H, W) = cat([x, relu(conv(x) + b)], channel)."""
    B, Cin, H, W = x_nchw.shape
    kh, kw, wCin, Gfull = weight_hwio.shape
    assert (kh, kw) == (KSIZE, KSIZE) and wCin >= Cin

    # USConv2d slimming (us=[True, True]): in_channels follow the input, out_channels scale
    # with width_mult.  Slicing happens wrapper-side; width_mult=None or 1.0 == full conv.
    G = int(Gfull * width_mult) if width_mult is not None else Gfull
    w_active = weight_hwio[:, :, :Cin, :G]
    b_active = bias[:G]

    if tile_h is None:
        # Largest divisor of H <= 64: bounds the per-step VMEM footprint (v7x: 64 MiB VMEM)
        # while keeping the matmul M = tile_h * W reasonably large.
        tile_h = max(d for d in range(1, min(H, 64) + 1) if H % d == 0)
    assert H % tile_h == 0, (H, tile_h)
    n_row_tiles = H // tile_h
    Wp = W + 2 * PAD

    # Layout glue (fused by XLA when this wrapper is jitted): NCHW -> NHWC + zero pad.
    x_nhwc = jnp.transpose(x_nchw, (0, 2, 3, 1))
    x_pad = jnp.pad(x_nhwc, ((0, 0), (PAD, PAD), (PAD, PAD), (0, 0)))
    # Weights/bias pre-cast to f32 wrapper-side so the kernel's MXU operands are ready to use.
    w2d = w_active.reshape(KSIZE * KSIZE * Cin, G).astype(jnp.float32)   # (ky, kx, cin) x G
    b2d = b_active.reshape(1, G).astype(jnp.float32)

    # Main rows of each row tile: padded rows [r*tile_h, r*tile_h + tile_h).
    main_spec = pl.BlockSpec((1, tile_h, Wp, Cin), lambda b, r: (b, r, 0, 0))
    # Halo rows: block size 1 along H => index_map returns the (padded) row index directly.
    halo_specs = [
        pl.BlockSpec((1, 1, Wp, Cin),
                     lambda b, r, k=k: (b, r * tile_h + tile_h + k, 0, 0))
        for k in range(2 * PAD)
    ]

    itemsize = jnp.dtype(x_nchw.dtype).itemsize
    cost = pl.CostEstimate(
        flops=2 * B * H * W * KSIZE * KSIZE * Cin * G,
        transcendentals=0,
        bytes_accessed=(B * (H + 2 * PAD) * Wp * Cin * itemsize      # padded input read
                        + KSIZE * KSIZE * Cin * G * 4 + G * 4        # weights + bias
                        + B * H * W * G * itemsize),                 # conv output write
    )

    conv_nhwc = pl.pallas_call(
        rdb_conv_kernel,
        out_shape=jax.ShapeDtypeStruct((B, H, W, G), x_nchw.dtype),
        grid_spec=pltpu.PrefetchScalarGridSpec(
            num_scalar_prefetch=0,
            grid=(B, n_row_tiles),
            in_specs=[main_spec] + halo_specs + [
                pl.BlockSpec((KSIZE * KSIZE * Cin, G), lambda b, r: (0, 0)),
                pl.BlockSpec((1, G), lambda b, r: (0, 0)),
            ],
            out_specs=pl.BlockSpec((1, tile_h, W, G), lambda b, r: (b, r, 0, 0)),
            scratch_shapes=[
                pltpu.VMEM((tile_h + 2 * PAD, Wp, Cin), x_nchw.dtype),
                pltpu.VMEM((tile_h * W, KSIZE * KSIZE * Cin), x_nchw.dtype),
            ],
        ),
        compiler_params=pltpu.CompilerParams(
            dimension_semantics=("parallel", "parallel")),
        cost_estimate=cost,
        interpret=interpret,
    )(x_pad, x_pad, x_pad, w2d, b2d)

    # torch.cat((x, out), dim=1): done outside the kernel so XLA fuses it with the transpose.
    out_conv_nchw = jnp.transpose(conv_nhwc, (0, 3, 1, 2))
    return jnp.concatenate([x_nchw, out_conv_nchw], axis=1)


def reference(x_nchw, weight_hwio, bias):
    """Pure-JAX reference matching nn.Conv2d(pad=1) + ReLU + cat."""
    w_oihw = jnp.transpose(weight_hwio, (3, 2, 0, 1))  # HWIO -> OIHW
    conv = lax.conv_general_dilated(
        x_nchw, w_oihw, window_strides=(1, 1), padding=((PAD, PAD), (PAD, PAD)),
        dimension_numbers=("NCHW", "OIHW", "NCHW"))
    conv = conv + bias[None, :, None, None]
    out = jnp.maximum(conv, 0.0)
    return jnp.concatenate([x_nchw, out], axis=1)


if __name__ == "__main__":
    B, Cin, H, W = 2, 4, 16, 16
    G = 8  # growRate

    key = jax.random.PRNGKey(0)
    kx, kw, kb = jax.random.split(key, 3)

    x = jax.random.normal(kx, (B, Cin, H, W), dtype=jnp.float32)
    # Deterministic "synthetic checkpoint" init (Kaiming-uniform-ish scale).
    fan_in = Cin * KSIZE * KSIZE
    bound = 1.0 / (fan_in ** 0.5)
    weight_hwio = jax.random.uniform(kw, (KSIZE, KSIZE, Cin, G),
                                     minval=-bound, maxval=bound, dtype=jnp.float32)
    bias = jax.random.uniform(kb, (G,), minval=-bound, maxval=bound, dtype=jnp.float32)

    # tile_h=8 -> grid (B=2, row_tiles=2): exercises the row-tiled pipeline even at toy sizes.
    fwd = jax.jit(lambda a, w, b: rdb_conv(a, w, b, tile_h=8))
    out = jax.block_until_ready(fwd(x, weight_hwio, bias))

    ref = jax.block_until_ready(reference(x, weight_hwio, bias))
    assert out.shape == (B, Cin + G, H, W), out.shape
    assert jnp.allclose(out, ref, atol=1e-5, rtol=1e-5), float(jnp.max(jnp.abs(out - ref)))

    print("KERNEL_OK")
</pallas_src>

<mosaic_0001>
module attributes {stable_mosaic.version = 11 : i64} {
  func.func @rdb_conv_kernel(%arg0: i32, %arg1: i32, %arg2: memref<1x8x18x4xf32, #tpu.memory_space<vmem>>, %arg3: memref<1x1x18x4xf32, #tpu.memory_space<vmem>>, %arg4: memref<1x1x18x4xf32, #tpu.memory_space<vmem>>, %arg5: memref<36x8xf32, #tpu.memory_space<vmem>>, %arg6: memref<1x8xf32, #tpu.memory_space<vmem>>, %arg7: memref<1x8x16x8xf32, #tpu.memory_space<vmem>>, %arg8: memref<10x18x4xf32, #tpu.memory_space<vmem>>, %arg9: memref<128x36xf32, #tpu.memory_space<vmem>>) attributes {dimension_semantics = [#tpu.dimension_semantics<parallel>, #tpu.dimension_semantics<parallel>], iteration_bounds = array<i64: 2, 2>, scalar_prefetch = 0 : i64, scratch_operands = 2 : i64, tpu.core_type = #tpu.core_type<tc>, window_params = [{transform_indices = @transform_0, window_bounds = array<i64: 1, 8, 18, 4>}, {transform_indices = @transform_1, window_bounds = array<i64: 1, 1, 18, 4>}, {transform_indices = @transform_2, window_bounds = array<i64: 1, 1, 18, 4>}, {pipeline_mode = #tpu.pipeline_mode<synchronous>, transform_indices = @transform_3, window_bounds = array<i64: 36, 8>}, {pipeline_mode = #tpu.pipeline_mode<synchronous>, transform_indices = @transform_4, window_bounds = array<i64: 1, 8>}, {transform_indices = @transform_5, window_bounds = array<i64: 1, 8, 16, 8>}]} {
    %c0 = arith.constant 0 : index
    %c0_0 = arith.constant 0 : index
    %c0_1 = arith.constant 0 : index
    %c0_2 = arith.constant 0 : index
    %0 = vector.load %arg2[%c0, %c0_0, %c0_1, %c0_2] : memref<1x8x18x4xf32, #tpu.memory_space<vmem>>, vector<1x8x18x4xf32>
    %1 = vector.shape_cast %0 : vector<1x8x18x4xf32> to vector<8x18x4xf32>
    %c0_3 = arith.constant 0 : index
    %c0_4 = arith.constant 0 : index
    %c0_5 = arith.constant 0 : index
    %2 = vector.load %arg8[%c0_3, %c0_4, %c0_5] : memref<10x18x4xf32, #tpu.memory_space<vmem>>, vector<8x18x4xf32>
    tpu.vector_store %arg8[%c0_3, %c0_4, %c0_5], %1 {strides = array<i32>} : memref<10x18x4xf32, #tpu.memory_space<vmem>>, vector<8x18x4xf32>,
    %c0_6 = arith.constant 0 : index
    %c0_7 = arith.constant 0 : index
    %c0_8 = arith.constant 0 : index
    %c0_9 = arith.constant 0 : index
    %3 = vector.load %arg3[%c0_6, %c0_7, %c0_8, %c0_9] : memref<1x1x18x4xf32, #tpu.memory_space<vmem>>, vector<1x1x18x4xf32>
    %4 = vector.shape_cast %3 : vector<1x1x18x4xf32> to vector<1x18x4xf32>
    %c8 = arith.constant 8 : index
    %c0_10 = arith.constant 0 : index
    %c0_11 = arith.constant 0 : index
    %5 = vector.load %arg8[%c8, %c0_10, %c0_11] : memref<10x18x4xf32, #tpu.memory_space<vmem>>, vector<1x18x4xf32>
    tpu.vector_store %arg8[%c8, %c0_10, %c0_11], %4 {strides = array<i32>} : memref<10x18x4xf32, #tpu.memory_space<vmem>>, vector<1x18x4xf32>,
    %c0_12 = arith.constant 0 : index
    %c0_13 = arith.constant 0 : index
    %c0_14 = arith.constant 0 : index
    %c0_15 = arith.constant 0 : index
    %6 = vector.load %arg4[%c0_12, %c0_13, %c0_14, %c0_15] : memref<1x1x18x4xf32, #tpu.memory_space<vmem>>, vector<1x1x18x4xf32>
    %7 = vector.shape_cast %6 : vector<1x1x18x4xf32> to vector<1x18x4xf32>
    %c9 = arith.constant 9 : index
    %c0_16 = arith.constant 0 : index
    %c0_17 = arith.constant 0 : index
    %8 = vector.load %arg8[%c9, %c0_16, %c0_17] : memref<10x18x4xf32, #tpu.memory_space<vmem>>, vector<1x18x4xf32>
    tpu.vector_store %arg8[%c9, %c0_16, %c0_17], %7 {strides = array<i32>} : memref<10x18x4xf32, #tpu.memory_space<vmem>>, vector<1x18x4xf32>,
    %c0_18 = arith.constant 0 : index
    %c0_19 = arith.constant 0 : index
    %c0_20 = arith.constant 0 : index
    %9 = vector.load %arg8[%c0_18, %c0_19, %c0_20] : memref<10x18x4xf32, #tpu.memory_space<vmem>>, vector<8x16x4xf32>
    %10 = vector.shape_cast %9 : vector<8x16x4xf32> to vector<128x4xf32>
    %c0_21 = arith.constant 0 : index
    %c0_22 = arith.constant 0 : index
    %11 = vector.load %arg9[%c0_21, %c0_22] : memref<128x36xf32, #tpu.memory_space<vmem>>, vector<128x4xf32>
    tpu.vector_store %arg9[%c0_21, %c0_22], %10 {strides = array<i32>} : memref<128x36xf32, #tpu.memory_space<vmem>>, vector<128x4xf32>,
    %c0_23 = arith.constant 0 : index
    %c1 = arith.constant 1 : index
    %c0_24 = arith.constant 0 : index
    %12 = vector.load %arg8[%c0_23, %c1, %c0_24] : memref<10x18x4xf32, #tpu.memory_space<vmem>>, vector<8x16x4xf32>
    %13 = vector.shape_cast %12 : vector<8x16x4xf32> to vector<128x4xf32>
    %c0_25 = arith.constant 0 : index
    %c4 = arith.constant 4 : index
    %14 = vector.load %arg9[%c0_25, %c4] : memref<128x36xf32, #tpu.memory_space<vmem>>, vector<128x4xf32>
    tpu.vector_store %arg9[%c0_25, %c4], %13 {strides = array<i32>} : memref<128x36xf32, #tpu.memory_space<vmem>>, vector<128x4xf32>,
    %c0_26 = arith.constant 0 : index
    %c2 = arith.constant 2 : index
    %c0_27 = arith.constant 0 : index
    %15 = vector.load %arg8[%c0_26, %c2, %c0_27] : memref<10x18x4xf32, #tpu.memory_space<vmem>>, vector<8x16x4xf32>
    %16 = vector.shape_cast %15 : vector<8x16x4xf32> to vector<128x4xf32>
    %c0_28 = arith.constant 0 : index
    %c8_29 = arith.constant 8 : index
    %17 = vector.load %arg9[%c0_28, %c8_29] : memref<128x36xf32, #tpu.memory_space<vmem>>, vector<128x4xf32>
    tpu.vector_store %arg9[%c0_28, %c8_29], %16 {strides = array<i32>} : memref<128x36xf32, #tpu.memory_space<vmem>>, vector<128x4xf32>,
    %c1_30 = arith.constant 1 : index
    %c0_31 = arith.constant 0 : index
    %c0_32 = arith.constant 0 : index
    %18 = vector.load %arg8[%c1_30, %c0_31, %c0_32] : memref<10x18x4xf32, #tpu.memory_space<vmem>>, vector<8x16x4xf32>
    %19 = vector.shape_cast %18 : vector<8x16x4xf32> to vector<128x4xf32>
    %c0_33 = arith.constant 0 : index
    %c12 = arith.constant 12 : index
    %20 = vector.load %arg9[%c0_33, %c12] : memref<128x36xf32, #tpu.memory_space<vmem>>, vector<128x4xf32>
    tpu.vector_store %arg9[%c0_33, %c12], %19 {strides = array<i32>} : memref<128x36xf32, #tpu.memory_space<vmem>>, vector<128x4xf32>,
    %c1_34 = arith.constant 1 : index
    %c1_35 = arith.constant 1 : index
    %c0_36 = arith.constant 0 : index
    %21 = vector.load %arg8[%c1_34, %c1_35, %c0_36] : memref<10x18x4xf32, #tpu.memory_space<vmem>>, vector<8x16x4xf32>
    %22 = vector.shape_cast %21 : vector<8x16x4xf32> to vector<128x4xf32>
    %c0_37 = arith.constant 0 : index
    %c16 = arith.constant 16 : index
    %23 = vector.load %arg9[%c0_37, %c16] : memref<128x36xf32, #tpu.memory_space<vmem>>, vector<128x4xf32>
    tpu.vector_store %arg9[%c0_37, %c16], %22 {strides = array<i32>} : memref<128x36xf32, #tpu.memory_space<vmem>>, vector<128x4xf32>,
    %c1_38 = arith.constant 1 : index
    %c2_39 = arith.constant 2 : index
    %c0_40 = arith.constant 0 : index
    %24 = vector.load %arg8[%c1_38, %c2_39, %c0_40] : memref<10x18x4xf32, #tpu.memory_space<vmem>>, vector<8x16x4xf32>
    %25 = vector.shape_cast %24 : vector<8x16x4xf32> to vector<128x4xf32>
    %c0_41 = arith.constant 0 : index
    %c20 = arith.constant 20 : index
    %26 = vector.load %arg9[%c0_41, %c20] : memref<128x36xf32, #tpu.memory_space<vmem>>, vector<128x4xf32>
    tpu.vector_store %arg9[%c0_41, %c20], %25 {strides = array<i32>} : memref<128x36xf32, #tpu.memory_space<vmem>>, vector<128x4xf32>,
    %c2_42 = arith.constant 2 : index
    %c0_43 = arith.constant 0 : index
    %c0_44 = arith.constant 0 : index
    %27 = vector.load %arg8[%c2_42, %c0_43, %c0_44] : memref<10x18x4xf32, #tpu.memory_space<vmem>>, vector<8x16x4xf32>
    %28 = vector.shape_cast %27 : vector<8x16x4xf32> to vector<128x4xf32>
    %c0_45 = arith.constant 0 : index
    %c24 = arith.constant 24 : index
    %29 = vector.load %arg9[%c0_45, %c24] : memref<128x36xf32, #tpu.memory_space<vmem>>, vector<128x4xf32>
    tpu.vector_store %arg9[%c0_45, %c24], %28 {strides = array<i32>} : memref<128x36xf32, #tpu.memory_space<vmem>>, vector<128x4xf32>,
    %c2_46 = arith.constant 2 : index
    %c1_47 = arith.constant 1 : index
    %c0_48 = arith.constant 0 : index
    %30 = vector.load %arg8[%c2_46, %c1_47, %c0_48] : memref<10x18x4xf32, #tpu.memory_space<vmem>>, vector<8x16x4xf32>
    %31 = vector.shape_cast %30 : vector<8x16x4xf32> to vector<128x4xf32>
    %c0_49 = arith.constant 0 : index
    %c28 = arith.constant 28 : index
    %32 = vector.load %arg9[%c0_49, %c28] : memref<128x36xf32, #tpu.memory_space<vmem>>, vector<128x4xf32>
    tpu.vector_store %arg9[%c0_49, %c28], %31 {strides = array<i32>} : memref<128x36xf32, #tpu.memory_space<vmem>>, vector<128x4xf32>,
    %c2_50 = arith.constant 2 : index
    %c2_51 = arith.constant 2 : index
    %c0_52 = arith.constant 0 : index
    %33 = vector.load %arg8[%c2_50, %c2_51, %c0_52] : memref<10x18x4xf32, #tpu.memory_space<vmem>>, vector<8x16x4xf32>
    %34 = vector.shape_cast %33 : vector<8x16x4xf32> to vector<128x4xf32>
    %c0_53 = arith.constant 0 : index
    %c32 = arith.constant 32 : index
    %35 = vector.load %arg9[%c0_53, %c32] : memref<128x36xf32, #tpu.memory_space<vmem>>, vector<128x4xf32>
    tpu.vector_store %arg9[%c0_53, %c32], %34 {strides = array<i32>} : memref<128x36xf32, #tpu.memory_space<vmem>>, vector<128x4xf32>,
    %c0_54 = arith.constant 0 : index
    %c0_55 = arith.constant 0 : index
    %36 = vector.load %arg9[%c0_54, %c0_55] : memref<128x36xf32, #tpu.memory_space<vmem>>, vector<128x36xf32>
    %c0_56 = arith.constant 0 : index
    %c0_57 = arith.constant 0 : index
    %37 = vector.load %arg5[%c0_56, %c0_57] : memref<36x8xf32, #tpu.memory_space<vmem>>, vector<36x8xf32>
    %cst = arith.constant dense<0.000000e+00> : vector<128x8xf32>
    %38 = tpu.matmul %36, %37, %cst {dimension_numbers = #tpu.dot_dimension_numbers<[1], [0], [0], [1], [0, 0, 1, 1], [], []>} : vector<128x36xf32>, vector<36x8xf32>, vector<128x8xf32> -> vector<128x8xf32>
    %c0_58 = arith.constant 0 : index
    %c0_59 = arith.constant 0 : index
    %39 = vector.load %arg6[%c0_58, %c0_59] : memref<1x8xf32, #tpu.memory_space<vmem>>, vector<1x8xf32>
    %40 = vector.broadcast %39 : vector<1x8xf32> to vector<128x8xf32>
    %41 = arith.addf %38, %40 : vector<128x8xf32>
    %cst_60 = arith.constant 0.000000e+00 : f32
    %42 = vector.broadcast %cst_60 : f32 to vector<128x8xf32>
    %43 = arith.maximumf %41, %42 : vector<128x8xf32>
    %44 = vector.shape_cast %43 : vector<128x8xf32> to vector<1x8x16x8xf32>
    %c0_61 = arith.constant 0 : index
    %c0_62 = arith.constant 0 : index
    %c0_63 = arith.constant 0 : index
    %c0_64 = arith.constant 0 : index
    %45 = vector.load %arg7[%c0_61, %c0_62, %c0_63, %c0_64] : memref<1x8x16x8xf32, #tpu.memory_space<vmem>>, vector<1x8x16x8xf32>
    tpu.vector_store %arg7[%c0_61, %c0_62, %c0_63, %c0_64], %44 {strides = array<i32>} : memref<1x8x16x8xf32, #tpu.memory_space<vmem>>, vector<1x8x16x8xf32>,
    return
  }
  func.func @transform_0(%arg0: i32, %arg1: i32) -> (i32, i32, i32, i32) {
    %c0_i32 = arith.constant 0 : i32
    %c0_i32_0 = arith.constant 0 : i32
    %c0_i32_1 = arith.constant 0 : i32
    return %arg0, %arg1, %c0_i32, %c0_i32_0 : i32, i32, i32, i32
  }
  func.func @transform_1(%arg0: i32, %arg1: i32) -> (i32, i32, i32, i32) {
    %c8_i32 = arith.constant 8 : i32
    %0 = arith.muli %arg1, %c8_i32 : i32
    %c8_i32_0 = arith.constant 8 : i32
    %1 = arith.addi %0, %c8_i32_0 : i32
    %c0_i32 = arith.constant 0 : i32
    %2 = arith.addi %1, %c0_i32 : i32
    %c0_i32_1 = arith.constant 0 : i32
    %c0_i32_2 = arith.constant 0 : i32
    %c0_i32_3 = arith.constant 0 : i32
    return %arg0, %2, %c0_i32_1, %c0_i32_2 : i32, i32, i32, i32
  }
  func.func @transform_2(%arg0: i32, %arg1: i32) -> (i32, i32, i32, i32) {
    %c8_i32 = arith.constant 8 : i32
    %0 = arith.muli %arg1, %c8_i32 : i32
    %c8_i32_0 = arith.constant 8 : i32
    %1 = arith.addi %0, %c8_i32_0 : i32
    %c1_i32 = arith.constant 1 : i32
    %2 = arith.addi %1, %c1_i32 : i32
    %c0_i32 = arith.constant 0 : i32
    %c0_i32_1 = arith.constant 0 : i32
    %c0_i32_2 = arith.constant 0 : i32
    return %arg0, %2, %c0_i32, %c0_i32_1 : i32, i32, i32, i32
  }
  func.func @transform_3(%arg0: i32, %arg1: i32) -> (i32, i32) {
    %c0_i32 = arith.constant 0 : i32
    %c0_i32_0 = arith.constant 0 : i32
    %c0_i32_1 = arith.constant 0 : i32
    return %c0_i32, %c0_i32_0 : i32, i32
  }
  func.func @transform_4(%arg0: i32, %arg1: i32) -> (i32, i32) {
    %c0_i32 = arith.constant 0 : i32
    %c0_i32_0 = arith.constant 0 : i32
    %c0_i32_1 = arith.constant 0 : i32
    return %c0_i32, %c0_i32_0 : i32, i32
  }
  func.func @transform_5(%arg0: i32, %arg1: i32) -> (i32, i32, i32, i32) {
    %c0_i32 = arith.constant 0 : i32
    %c0_i32_0 = arith.constant 0 : i32
    %c0_i32_1 = arith.constant 0 : i32
    return %arg0, %arg1, %c0_i32, %c0_i32_0 : i32, i32, i32, i32
  }
}

</mosaic_0001>

<bundles_post_ra>
// kernel: _lambda_.1
= control target key start
LH: loop header
LB: loop body
LE: loop exit
PB: predicated region body
PF: predicated region fallthrough
CT: control target
= control target key end

     0   :  { %s1765_s18 = smov 0   ;;  %s1767_s19 = smov 0   ;;  %s2481_s0 = inlined_call_operand.vmem [shape: f32[2,18,18,4], index: 0, kind: input, shape index: {}, may-alias: {0,1,2}]   ;;  %s2482_s1 = inlined_call_operand.vmem [shape: f32[2,18,18,4], index: 1, kind: input, shape index: {}, may-alias: {0,1,2}]   ;;  %s2483_s2 = inlined_call_operand.vmem [shape: f32[2,18,18,4], index: 2, kind: input, shape index: {}, may-alias: {0,1,2}]   ;;  %s2484_s3 = inlined_call_operand.vmem [shape: f32[36,8], index: 3, kind: input, shape index: {}]   ;;  %s2485_s4 = inlined_call_operand.vmem [shape: f32[1,8], index: 4, kind: input, shape index: {}]   ;;  %s2486_s5 = inlined_call_operand.vmem [shape: f32[2,16,16,8], index: 5, kind: output, shape index: {}]  }
   0x1   :  { %s1769_s20 = smov 0   ;;  %s1771_s21 = smov 0  }
   0x2   :  { %s1773_s22 = smov 0  }
   0x3 LB: > { %s24_s23 = sadd.s32 1, %s1717_s20  ;;  %s27_s24 = sadd.s32 1, %s1721_s21  ;;  %s1725_s22 = sphi %s1773_s22, %s15_s22   ;;  %s1721_s21 = sphi %s1771_s21, %s2490_s21   ;;  %s1717_s20 = sphi %s1769_s20, %s2489_s20   ;;  %s1713_s19 = sphi %s1767_s19, %s2488_s19   ;;  %s1709_s18 = sphi %s1765_s18, %s2487_s18  }
   0x4   : > { %p25_p0 = scmp.ge.s32.totalorder %s24_s23, 2  ;;  %p1589_p1 = scmp.ge.s32.totalorder %s1725_s22, 1 }
   0x5   : > { %p267_p2 = scmp.lt.s32.totalorder %s1725_s22, 5 }
   0x6   : > { %s2492_s23 = smov (%p25_p0, %s24_s23), 0  ;;  %s2494_s24 = smov (!%p25_p0, %s27_s24), %s1721_s21 }
   0x7   : > { %p268_p3 = pnand %p1589_p1, %p267_p2  ;;  %p29_p4 = scmp.ge.s32.totalorder %s2494_s24, 2 }
   0x8   : > { %s1795_s25 = sshll.u32 (!%p268_p3), %s1709_s18, 3  ;;  %p338_p5 = scmp.lt.s32.totalorder (!%p268_p3), %s1713_s19, 1 }
   0x9   : > { %s2496_s24 = smov (%p29_p4, %s2494_s24), 0  ;;  %271 = sbr.rel (%p268_p3) target bundleno = 624 (0x270), region = 40 }
   0xa   : > { %p340_p6 = scmp.lt.s32.totalorder (!%p268_p3), %s1795_s25, 17  ;;  %s1727_s9 = smov (!%p268_p3), 4  }
   0xb   : > { %s1728_s10 = smov (!%p268_p3), 8   ;;  %s354_s11 = sadd.s32 (!%p268_p3), 8, %s1795_s25 }
   0xc   : > { %p357_p7 = scmp.lt.s32.totalorder (!%p268_p3), %s354_s11, 17  ;;  %s1729_s18 = smov (!%p268_p3), 12  }
   0xd   : > { %s1734_s6 = smov (!%p268_p3), 32   ;;  %s367_s7 = sadd.s32 (!%p268_p3), 9, %s1795_s25 }
   0xe   : > { %s2498_s19 = smov (!%p338_p5, %s1713_s19), 1  ;;  %vm414_vm0 = vcmask 31744   ;;  %vm417_vm1 = vcmask 25600   ;;  %s2500_s11 = smov (!%p357_p7, %s354_s11), 17  ;;  %vm566_vm2 = vcmask 64544   ;;  %vm663_vm3 = vcmask 97344  }
   0xf   : > { %s341_s26 = scalar_select %p340_p6, %s1795_s25, 17  ;;  %vm761_vm4 = vcmask 130144   ;;  %vm858_vm5 = vcmask 162944   ;;  %vm955_vm6 = vcmask 195744   ;;  %vm1338_vm7 = vcmask 1043456  }
  0x10   : > { %s1802_s27 = smul.u32 54, %s2498_s19  ;;  %p370_p8 = scmp.lt.s32.totalorder %s367_s7, 17  ;;  %vm1053_vm8 = vcmask 228544   ;;  %vm1150_vm9 = vcmask 261344   ;;  %vm1247_vm10 = vcmask 294144   ;;  %vm1289_vm11 = vcmask 293888  }
  0x11   : > { %s1634_s28 = smul.u32 3, %s341_s26  ;;  %s1730_s26 = smov 16   ;;  %vm1423_vm12 = vcmask 64512  }
  0x12   : > { %s1636_s12 = smul.u32 3, %s2500_s11  ;;  %s2502_s7 = smov (!%p370_p8, %s367_s7), 17 }
  0x13   : > { %s344_s29 = sadd.s32 %s1802_s27, %s1634_s28  ;;  %s1731_s28 = smov 24  }
  0x14   : > { %s1591_s30 = sshll.u32 %s344_s29, 3  ;;  %s361_s13 = sadd.s32 %s1636_s12, %s1802_s27 }
  0x15   : > { %s1808_s8 = scalar_lea.vmem %s2481_s0, %s1591_s30  ;;  %s1593_s14 = sshll.u32 %s361_s13, 3 }
  0x16   : > { %v393_v0 = vld [vmem:[%s1808_s8 + $0x18] sm:$0xff]  ;;  %v394_v1 = vld [vmem:[%s1808_s8 + $0x20] sm:$0xff]  ;;  %v391_v3 = vld [vmem:[%s1808_s8 + $0x8] sm:$0xff]  ;;  %s1995_s17 = scalar_lea.vmem %s2482_s1, %s1593_s14  ;;  %s1732_s29 = smov 20  }
  0x17   : > { %v390_v2 = vld [vmem:[%s1808_s8] sm:$0xff]  ;;  %419 = vst.msk [vmem:[#allocation2 + $0x18] sm:$0xff] %vm414_vm0, %v393_v0  ;;  %v395_v4 = vld [vmem:[%s1808_s8 + $0x28] sm:$0x3]  ;;  %v392_v5 = vld [vmem:[%s1808_s8 + $0x10] sm:$0x3] }
  0x18   : > { %420 = vst.msk [vmem:[#allocation2 + $0x20] sm:$0xff] %vm414_vm0, %v394_v1  ;;  %v400_v6 = vld [vmem:[%s1808_s8 + $0x50] sm:$0xff]  ;;  %v401_v7 = vld [vmem:[%s1808_s8 + $0x58] sm:$0x3]  ;;  %v399_v8 = vld [vmem:[%s1808_s8 + $0x48] sm:$0xff]  ;;  %s1733_s30 = smov 28  }
  0x19   : > { %415 = vst.msk [vmem:[#allocation2] sm:$0xff] %vm414_vm0, %v390_v2  ;;  %v405_v9 = vld [vmem:[%s1808_s8 + $0x78] sm:$0xff]  ;;  %v406_v10 = vld [vmem:[%s1808_s8 + $0x80] sm:$0xff]  ;;  %v403_v12 = vld [vmem:[%s1808_s8 + $0x68] sm:$0xff]  ;;  %p382_p9 = scmp.lt.s32.totalorder %s1795_s25, 15 }
  0x1a   : > { %416 = vst.msk [vmem:[#allocation2 + $0x8] sm:$0xff] %vm414_vm0, %v391_v3  ;;  %v404_v13 = vld [vmem:[%s1808_s8 + $0x70] sm:$0x3]  ;;  %v397_v16 = vld [vmem:[%s1808_s8 + $0x38] sm:$0xff]  ;;  %v410_v18 = vld [vmem:[%s1808_s8 + $0xa0] sm:$0x3] }
  0x1b   : > { %421 = vst.msk [vmem:[#allocation2 + $0x28] sm:$0x3] %vm417_vm1, %v395_v4  ;;  %v396_v15 = vld [vmem:[%s1808_s8 + $0x30] sm:$0xff]  ;;  %v409_v17 = vld [vmem:[%s1808_s8 + $0x98] sm:$0xff]  ;;  %v398_v21 = vld [vmem:[%s1808_s8 + $0x40] sm:$0x3] }
  0x1c   : > { %418 = vst.msk [vmem:[#allocation2 + $0x10] sm:$0x3] %vm417_vm1, %v392_v5  ;;  %v408_v20 = vld [vmem:[%s1808_s8 + $0x90] sm:$0xff]  ;;  %v413_v24 = vld [vmem:[%s1808_s8 + $0xb8] sm:$0x3]  ;;  %v402_v25 = vld [vmem:[%s1808_s8 + $0x60] sm:$0xff] }
  0x1d   : > { %426 = vst.msk [vmem:[#allocation2 + $0x50] sm:$0xff] %vm414_vm0, %v400_v6  ;;  %v412_v23 = vld [vmem:[%s1808_s8 + $0xb0] sm:$0xff]  ;;  %v407_v29 = vld [vmem:[%s1808_s8 + $0x88] sm:$0x3]  ;;  %v440_v0 = vld [vmem:[%s1995_s17] sm:$0xff]  ;;  %s2504_s25 = smov (!%p382_p9, %s1795_s25), 15 }
  0x1e   : > { %427 = vst.msk [vmem:[#allocation2 + $0x58] sm:$0x3] %vm417_vm1, %v401_v7  ;;  %v411_v33 = vld [vmem:[%s1808_s8 + $0xa8] sm:$0xff]  ;;  %v681_v59 = vld [vmem:[#allocation2 + $0x18] sm:$0xff]  ;;  %s1637_s8 = smul.u32 3, %s2502_s7 }
  0x1f   : > { %v1829_v11 = vld [vmem:[#allocation2 + $0x19] sm:$0xff]  ;;  %425 = vst.msk [vmem:[#allocation2 + $0x48] sm:$0xff] %vm414_vm0, %v399_v8 }
  0x20   : > { %522 = vrot.lane.b32.xlu1 %v1829_v11, %s1727_s9  ;;  %431 = vst.msk [vmem:[#allocation2 + $0x78] sm:$0xff] %vm414_vm0, %v405_v9  ;;  %v1919_v42 = vld [vmem:[#allocation2 + $0x1a] sm:$0xff] }
  0x21   : > { %v486_v14 = vld [vmem:[#allocation2 + $0x1] sm:$0xff]  ;;  %432 = vst.msk [vmem:[#allocation2 + $0x80] sm:$0xff] %vm414_vm0, %v406_v10 }
  0x22   : > { %518 = vrot.lane.b32.xlu0 %v486_v14, %s1727_s9  ;;  %429 = vst.msk [vmem:[#allocation2 + $0x68] sm:$0xff] %vm414_vm0, %v403_v12  ;;  %v1846_v19 = vld [vmem:[#allocation2 + $0x21] sm:$0xff] }
  0x23   : > { %430 = vst.msk [vmem:[#allocation2 + $0x70] sm:$0x3] %vm417_vm1, %v404_v13  ;;  %v487_v22 = vld [vmem:[#allocation2 + $0x9] sm:$0xff]  ;;  %v682_v47 = vld [vmem:[#allocation2 + $0x20] sm:$0xff] }
  0x24   : > { %422 = vst.msk [vmem:[#allocation2 + $0x30] sm:$0xff] %vm414_vm0, %v396_v15  ;;  %v583_v38 = vld [vmem:[#allocation2 + $0x2] sm:$0xff]  ;;  %v584_v43 = vld [vmem:[#allocation2 + $0xa] sm:$0xff] }
  0x25   : > { %423 = vst.msk [vmem:[#allocation2 + $0x38] sm:$0xff] %vm414_vm0, %v397_v16  ;;  %v1866_v27 = vld [vmem:[#allocation2 + $0x51] sm:$0xff]  ;;  %v1915_v41 = vld [vmem:[#allocation2 + $0x22] sm:$0xff] }
  0x26   : > { %435 = vst.msk [vmem:[#allocation2 + $0x98] sm:$0xff] %vm414_vm0, %v409_v17  ;;  %v1870_v28 = vld [vmem:[#allocation2 + $0x49] sm:$0xff]  ;;  %v1960_v53 = vld [vmem:[#allocation2 + $0x52] sm:$0xff]  ;;  %v454_v2 = vld [vmem:[#allocation2] sm:$0xff] }
  0x27   : > { %436 = vst.msk [vmem:[#allocation2 + $0xa0] sm:$0x3] %vm417_vm1, %v410_v18  ;;  %v1929_v45 = vld [vmem:[#allocation2 + $0x4a] sm:$0xff]  ;;  %v1962_v54 = vld [vmem:[#allocation2 + $0x78] sm:$0xff] }
  0x28   : > { %524 = vrot.lane.b32.xlu1 %v1846_v19, %s1727_s9  ;;  %434 = vst.msk [vmem:[#allocation2 + $0x90] sm:$0xff] %vm414_vm0, %v408_v20  ;;  %v1880_v31 = vld [vmem:[#allocation2 + $0x79] sm:$0xff]  ;;  %v1942_v49 = vld [vmem:[#allocation2 + $0x50] sm:$0xff]  ;;  %v1954_v52 = vld [vmem:[#allocation2 + $0x48] sm:$0xff] }
  0x29   : > { %424 = vst.msk [vmem:[#allocation2 + $0x40] sm:$0x3] %vm417_vm1, %v398_v21  ;;  %v1974_v57 = vld [vmem:[#allocation2 + $0x68] sm:$0xff]  ;;  %v1981_v58 = vld [vmem:[#allocation2 + $0x7a] sm:$0xff] }
  0x2a   : > { %520 = vrot.lane.b32.xlu0 %v487_v22, %s1727_s9  ;;  %438 = vst.msk [vmem:[#allocation2 + $0xb0] sm:$0xff] %vm414_vm0, %v412_v23  ;;  %v1884_v32 = vld [vmem:[#allocation2 + $0x69] sm:$0xff]  ;;  %v2037_v7 = vld [vmem:[#allocation2 + $0x80] sm:$0xff] }
  0x2b   : > { %439 = vst.msk [vmem:[#allocation2 + $0xb8] sm:$0x3] %vm417_vm1, %v413_v24  ;;  %v1925_v44 = vld [vmem:[#allocation2 + $0x30] sm:$0xff]  ;;  %v455_v5 = vld [vmem:[#allocation2 + $0x8] sm:$0xff] }
  0x2c   : > { %v1863_v26 = vld [vmem:[#allocation2 + $0x31] sm:$0xff]  ;;  %428 = vst.msk [vmem:[#allocation2 + $0x60] sm:$0xff] %vm414_vm0, %v402_v25  ;;  %v441_v12 = vld [vmem:[%s1995_s17 + $0x8] sm:$0xff] }
  0x2d   : > { %526 = vrot.lane.b32.xlu2 %v1863_v26, %s1727_s9  ;;  %433 = vst.msk [vmem:[#allocation2 + $0x88] sm:$0x3] %vm417_vm1, %v407_v29  ;;  %v1940_v48 = vld [vmem:[#allocation2 + $0x32] sm:$0xff]  ;;  %v1946_v50 = vld [vmem:[#allocation2 + $0x6a] sm:$0xff] }
  0x2e   : > { %437 = vst.msk [vmem:[#allocation2 + $0xa8] sm:$0xff] %vm414_vm0, %v411_v33  ;;  %v1894_v35 = vld [vmem:[#allocation2 + $0x99] sm:$0xff] }
  0x2f   : > { %v1898_v36 = vld [vmem:[#allocation2 + $0x91] sm:$0xff]  ;;  %474 = vst.msk [vmem:[#allocation3 + $0x20] sm:$0xff] %vm414_vm0, %v1925_v44  ;;  %v2008_v1 = vld [vmem:[#allocation2 + $0x9a] sm:$0xff] }
  0x30   : > { %532 = vrot.lane.b32.xlu1 %v1866_v27, %s1727_s9  ;;  %v1878_v30 = vld [vmem:[#allocation2 + $0x39] sm:$0xff]  ;;  %473 = vst.msk [vmem:[#allocation3 + $0x18] sm:$0xff] %vm414_vm0, %v682_v47  ;;  %v2001_v63 = vld [vmem:[#allocation2 + $0x90] sm:$0xff] }
  0x31   : > { %v1932_v46 = vld [vmem:[#allocation2 + $0x3a] sm:$0xff]  ;;  %477 = vst.msk [vmem:[#allocation3 + $0x38] sm:$0xff] %vm414_vm0, %v1942_v49  ;;  %v1966_v55 = vld [vmem:[#allocation2 + $0x92] sm:$0xff] }
  0x32   : > { %530 = vrot.lane.b32.xlu0 %v1870_v28, %s1727_s9  ;;  %v1908_v39 = vld [vmem:[#allocation2 + $0xb1] sm:$0xff]  ;;  %476 = vst.msk [vmem:[#allocation3 + $0x30] sm:$0xff] %vm414_vm0, %v1954_v52 }
  0x33   : > { %v1892_v34 = vld [vmem:[#allocation2 + $0x61] sm:$0xff]  ;;  %480 = vst.msk [vmem:[#allocation3 + $0x50] sm:$0xff] %vm414_vm0, %v1962_v54  ;;  %v1983_v60 = vld [vmem:[#allocation2 + $0x98] sm:$0xff]  ;;  %v2020_v4 = vld [vmem:[#allocation2 + $0xb0] sm:$0xff] }
  0x34   : > { %v1904_v37 = vld [vmem:[#allocation2 + $0x81] sm:$0xff]  ;;  %479 = vst.msk [vmem:[#allocation3 + $0x48] sm:$0xff] %vm414_vm0, %v1974_v57  ;;  %v1988_v61 = vld [vmem:[#allocation2 + $0xb2] sm:$0xff] }
  0x35   : > { %528 = vrot.lane.b32.xlu2 %v1878_v30, %s1727_s9  ;;  %v1913_v40 = vld [vmem:[#allocation2 + $0xa9] sm:$0xff]  ;;  %472 = vst.msk [vmem:[#allocation3 + $0x10] sm:$0xff] %vm414_vm0, %v681_v59  ;;  %v2014_v3 = vld [vmem:[#allocation2 + $0x38] sm:$0xff]  ;;  %v2027_v6 = vld [vmem:[#allocation2 + $0x60] sm:$0xff] }
  0x36   : > { %v1950_v51 = vld [vmem:[#allocation2 + $0x62] sm:$0xff]  ;;  %483 = vst.msk [vmem:[#allocation3 + $0x68] sm:$0xff] %vm414_vm0, %v1983_v60  ;;  %v1997_v62 = vld [vmem:[#allocation2 + $0xaa] sm:$0xff] }
  0x37   : > { %v1970_v56 = vld [vmem:[#allocation2 + $0x82] sm:$0xff]  ;;  %482 = vst.msk [vmem:[#allocation3 + $0x60] sm:$0xff] %vm414_vm0, %v2001_v63 }
  0x38   : > { %538 = vrot.lane.b32.xlu1 %v1880_v31, %s1727_s9  ;;  %444 = vst.msk [vmem:[#allocation2 + $0xc0] sm:$0xff] %vm414_vm0, %v440_v0  ;;  %v2048_v9 = vld [vmem:[#allocation2 + $0xa8] sm:$0xff] }
  0x39   : > { %470 = vst.msk [vmem:[#allocation3] sm:$0xff] %vm414_vm0, %v454_v2 }
  0x3a   : > { %536 = vrot.lane.b32.xlu0 %v1884_v32, %s1727_s9  ;;  %475 = vst.msk [vmem:[#allocation3 + $0x28] sm:$0xff] %vm414_vm0, %v2014_v3 }
  0x3b   : > { %485 = vst.msk [vmem:[#allocation3 + $0x78] sm:$0xff] %vm414_vm0, %v2020_v4 }
  0x3c   : > { %471 = vst.msk [vmem:[#allocation3 + $0x8] sm:$0xff] %vm414_vm0, %v455_v5 }
  0x3d   : > { %534 = vrot.lane.b32.xlu2 %v1892_v34, %s1727_s9  ;;  %478 = vst.msk [vmem:[#allocation3 + $0x40] sm:$0xff] %vm414_vm0, %v2027_v6 }
  0x3e   : > { %481 = vst.msk [vmem:[#allocation3 + $0x58] sm:$0xff] %vm414_vm0, %v2037_v7 }
  0x3f   : > { %484 = vst.msk [vmem:[#allocation3 + $0x70] sm:$0xff] %vm414_vm0, %v2048_v9  ;;  %v2061_v15 = vld [vmem:[#allocation2 + $0xc0] sm:$0xff] }
  0x40   : > { %544 = vrot.lane.b32.xlu1 %v1894_v35, %s1727_s9  ;;  %445 = vst.msk [vmem:[#allocation2 + $0xc8] sm:$0xff] %vm414_vm0, %v441_v12  ;;  %v442_v12 = vld [vmem:[%s1995_s17 + $0x10] sm:$0x3] }
  0x41   : > { %446 = vst.msk [vmem:[#allocation2 + $0xd0] sm:$0x3] %vm417_vm1, %v442_v12 }
  0x42   : > { %542 = vrot.lane.b32.xlu0 %v1898_v36, %s1727_s9 }
  0x45   : > { %540 = vrot.lane.b32.xlu2 %v1904_v37, %s1727_s9 }
  0x47   : > { %v2079_v22 = vld [vmem:[#allocation2 + $0xc8] sm:$0xff] }
  0x48   : > { %615 = vrot.lane.b32.xlu1 %v583_v38, %s1728_s10  ;;  %v2119_v0 = vld [vmem:[#allocation2 + $0xc1] sm:$0xff] }
  0x4a   : > { %548 = vrot.lane.b32.xlu0 %v1908_v39, %s1727_s9 }
  0x4d   : > { %546 = vrot.lane.b32.xlu2 %v1913_v40, %s1727_s9  ;;  %s374_s9 = sadd.s32 %s1637_s8, %s1802_s27 }
  0x50   : > { %621 = vrot.lane.b32.xlu1 %v1915_v41, %s1728_s10 }
  0x52   : > { %619 = vrot.lane.b32.xlu0 %v1919_v42, %s1728_s10 }
  0x55   : > { %617 = vrot.lane.b32.xlu2 %v584_v43, %s1728_s10 }
  0x58   : > { %627 = vrot.lane.b32.xlu1 %v1929_v45, %s1728_s10 }
  0x5a   : > { %625 = vrot.lane.b32.xlu0 %v1932_v46, %s1728_s10 }
  0x5d   : > { %623 = vrot.lane.b32.xlu2 %v1940_v48, %s1728_s10 }
  0x60   : > { %633 = vrot.lane.b32.xlu1 %v1946_v50, %s1728_s10 }
  0x62   : > { %631 = vrot.lane.b32.xlu0 %v1950_v51, %s1728_s10 }
  0x65   : > { %629 = vrot.lane.b32.xlu2 %v1960_v53, %s1728_s10 }
  0x68   : > { %639 = vrot.lane.b32.xlu1 %v1966_v55, %s1728_s10 }
  0x6a   : > { %637 = vrot.lane.b32.xlu0 %v1970_v56, %s1728_s10 }
  0x6d   : > { %635 = vrot.lane.b32.xlu2 %v1981_v58, %s1728_s10 }
  0x70   : > { %645 = vrot.lane.b32.xlu1 %v1988_v61, %s1728_s10 }
  0x72   : > { %643 = vrot.lane.b32.xlu0 %v1997_v62, %s1728_s10 }
  0x75   : > { %641 = vrot.lane.b32.xlu2 %v2008_v1, %s1728_s10  ;;  %s1595_s10 = sshll.u32 %s374_s9, 3 }
  0x76   : > { %s2197_s13 = scalar_lea.vmem %s2483_s2, %s1595_s10 }
  0x78   : > { %717 = vrot.lane.b32.xlu1 %v1925_v44, %s1729_s18 }
  0x7a   : > { %715 = vrot.lane.b32.xlu0 %v682_v47, %s1729_s18 }
  0x7d   : > { %713 = vrot.lane.b32.xlu2 %v681_v59, %s1729_s18 }
  0x80   : > { %723 = vrot.lane.b32.xlu1 %v1942_v49, %s1729_s18 }
  0x82   : > { %721 = vrot.lane.b32.xlu0 %v1954_v52, %s1729_s18 }
  0x85   : > { %719 = vrot.lane.b32.xlu2 %v2014_v3, %s1729_s18 }
  0x87   : > { %v527_v8 = vpop.permute.xlu2 %526 }
  0x88   : > { %729 = vrot.lane.b32.xlu1 %v1962_v54, %s1729_s18  ;;  %571 = vst.msk [vmem:[#allocation3 + $0x20] sm:$0xff] %vm566_vm2, %v527_v8  ;;  %v2132_v8 = vld [vmem:[#allocation2 + $0xc2] sm:$0xff] }
  0x8a   : > { %727 = vrot.lane.b32.xlu0 %v1974_v57, %s1729_s18 }
  0x8d   : > { %725 = vrot.lane.b32.xlu2 %v2027_v6, %s1729_s18 }
  0x8f   : > { %v529_v10 = vpop.permute.xlu2 %528 }
  0x90   : > { %735 = vrot.lane.b32.xlu1 %v1983_v60, %s1729_s18  ;;  %572 = vst.msk [vmem:[#allocation3 + $0x28] sm:$0xff] %vm566_vm2, %v529_v10 }
  0x92   : > { %733 = vrot.lane.b32.xlu0 %v2001_v63, %s1729_s18  ;;  %v523_v13 = vpop.permute.xlu1 %522 }
  0x93   : > { %569 = vst.msk [vmem:[#allocation3 + $0x10] sm:$0xff] %vm566_vm2, %v523_v13 }
  0x94   : > { %v519_v14 = vpop.permute.xlu0 %518 }
  0x95   : > { %567 = vst.msk [vmem:[#allocation3] sm:$0xff] %vm566_vm2, %v519_v14  ;;  %731 = vrot.lane.b32.xlu2 %v2037_v7, %s1729_s18 }
  0x97   : > { %v535_v16 = vpop.permute.xlu2 %534 }
  0x98   : > { %741 = vrot.lane.b32.xlu1 %v2061_v15, %s1729_s18  ;;  %575 = vst.msk [vmem:[#allocation3 + $0x40] sm:$0xff] %vm566_vm2, %v535_v16 }
  0x9a   : > { %739 = vrot.lane.b32.xlu0 %v2020_v4, %s1729_s18  ;;  %v525_v17 = vpop.permute.xlu1 %524 }
  0x9b   : > { %570 = vst.msk [vmem:[#allocation3 + $0x18] sm:$0xff] %vm566_vm2, %v525_v17 }
  0x9c   : > { %v521_v18 = vpop.permute.xlu0 %520 }
  0x9d   : > { %568 = vst.msk [vmem:[#allocation3 + $0x8] sm:$0xff] %vm566_vm2, %v521_v18  ;;  %737 = vrot.lane.b32.xlu2 %v2048_v9, %s1729_s18 }
  0x9f   : > { %v541_v20 = vpop.permute.xlu2 %540 }
  0xa0   : > { %812 = vrot.lane.b32.xlu1 %v1846_v19, %s1730_s26  ;;  %578 = vst.msk [vmem:[#allocation3 + $0x58] sm:$0xff] %vm566_vm2, %v541_v20 }
  0xa2   : > { %810 = vrot.lane.b32.xlu0 %v1829_v11, %s1730_s26  ;;  %v533_v21 = vpop.permute.xlu1 %532 }
  0xa3   : > { %574 = vst.msk [vmem:[#allocation3 + $0x38] sm:$0xff] %vm566_vm2, %v533_v21 }
  0xa4   : > { %v531_v23 = vpop.permute.xlu0 %530 }
  0xa5   : > { %573 = vst.msk [vmem:[#allocation3 + $0x30] sm:$0xff] %vm566_vm2, %v531_v23  ;;  %743 = vrot.lane.b32.xlu2 %v2079_v22, %s1729_s18 }
  0xa7   : > { %v547_v24 = vpop.permute.xlu2 %546 }
  0xa8   : > { %818 = vrot.lane.b32.xlu1 %v1870_v28, %s1730_s26  ;;  %581 = vst.msk [vmem:[#allocation3 + $0x70] sm:$0xff] %vm566_vm2, %v547_v24 }
  0xaa   : > { %816 = vrot.lane.b32.xlu0 %v1878_v30, %s1730_s26  ;;  %v539_v11 = vpop.permute.xlu1 %538 }
  0xab   : > { %577 = vst.msk [vmem:[#allocation3 + $0x50] sm:$0xff] %vm566_vm2, %v539_v11 }
  0xac   : > { %v537_v19 = vpop.permute.xlu0 %536 }
  0xad   : > { %576 = vst.msk [vmem:[#allocation3 + $0x48] sm:$0xff] %vm566_vm2, %v537_v19  ;;  %814 = vrot.lane.b32.xlu2 %v1863_v26, %s1730_s26 }
  0xaf   : > { %v618_v25 = vpop.permute.xlu2 %617 }
  0xb0   : > { %824 = vrot.lane.b32.xlu1 %v1884_v32, %s1730_s26  ;;  %665 = vst.msk [vmem:[#allocation3 + $0x8] sm:$0xff] %vm663_vm3, %v618_v25  ;;  %v447_v25 = vld [vmem:[%s2197_s13] sm:$0xff] }
  0xb1   : > { %451 = vst.msk [vmem:[#allocation2 + $0xd8] sm:$0xff] %vm414_vm0, %v447_v25 }
  0xb2   : > { %822 = vrot.lane.b32.xlu0 %v1892_v34, %s1730_s26  ;;  %v545_v29 = vpop.permute.xlu1 %544 }
  0xb3   : > { %580 = vst.msk [vmem:[#allocation3 + $0x68] sm:$0xff] %vm566_vm2, %v545_v29  ;;  %v448_v29 = vld [vmem:[%s2197_s13 + $0x8] sm:$0xff] }
  0xb4   : > { %v543_v33 = vpop.permute.xlu0 %542  ;;  %452 = vst.msk [vmem:[#allocation2 + $0xe0] sm:$0xff] %vm414_vm0, %v448_v29 }
  0xb5   : > { %579 = vst.msk [vmem:[#allocation3 + $0x60] sm:$0xff] %vm566_vm2, %v543_v33  ;;  %820 = vrot.lane.b32.xlu2 %v1866_v27, %s1730_s26 }
  0xb7   : > { %v624_v38 = vpop.permute.xlu2 %623 }
  0xb8   : > { %834 = vrot.lane.b32.xlu1 %v1913_v40, %s1730_s26  ;;  %668 = vst.msk [vmem:[#allocation3 + $0x20] sm:$0xff] %vm663_vm3, %v624_v38  ;;  %v2206_v38 = vld [vmem:[#allocation2 + $0xca] sm:$0xff] }
  0xba   : > { %828 = vrot.lane.b32.xlu0 %v1904_v37, %s1730_s26  ;;  %v616_v43 = vpop.permute.xlu1 %615 }
  0xbb   : > { %664 = vst.msk [vmem:[#allocation3] sm:$0xff] %vm663_vm3, %v616_v43 }
  0xbc   : > { %v549_v47 = vpop.permute.xlu0 %548 }
  0xbd   : > { %582 = vst.msk [vmem:[#allocation3 + $0x78] sm:$0xff] %vm566_vm2, %v549_v47  ;;  %826 = vrot.lane.b32.xlu2 %v1880_v31, %s1730_s26 }
  0xbf   : > { %v630_v59 = vpop.permute.xlu2 %629 }
  0xc0   : > { %1021 = vrot.lane.b32.xlu1 %v2001_v63, %s1731_s28  ;;  %671 = vst.msk [vmem:[#allocation3 + $0x38] sm:$0xff] %vm663_vm3, %v630_v59 }
  0xc2   : > { %931 = vrot.lane.b32.xlu0 %v1997_v62, %s1732_s29  ;;  %v622_v27 = vpop.permute.xlu1 %621 }
  0xc3   : > { %667 = vst.msk [vmem:[#allocation3 + $0x18] sm:$0xff] %vm663_vm3, %v622_v27 }
  0xc4   : > { %v620_v37 = vpop.permute.xlu0 %619 }
  0xc5   : > { %666 = vst.msk [vmem:[#allocation3 + $0x10] sm:$0xff] %vm663_vm3, %v620_v37  ;;  %923 = vrot.lane.b32.xlu2 %v1981_v58, %s1732_s29 }
  0xc7   : > { %v636_v2 = vpop.permute.xlu2 %635 }
  0xc8   : > { %1126 = vrot.lane.b32.xlu1 %v2119_v0, %s1733_s30  ;;  %674 = vst.msk [vmem:[#allocation3 + $0x50] sm:$0xff] %vm663_vm3, %v636_v2  ;;  %v1284_v2 = vld [vmem:[%s2484_s3 + $0x20] sm:$0xf] }
  0xc9   : > { %1620 = vmatpush.msk.msra.mxu2 %vm1338_vm7, %v1284_v2  ;;  %1621 = vmatpush.msk.msra.mxu3 %vm1338_vm7, %v1284_v2 }
  0xca   : > { %1118 = vrot.lane.b32.xlu0 %v1898_v36, %s1733_s30  ;;  %v628_v63 = vpop.permute.xlu1 %627  ;;  %1600 = vmatpush.msk.msra.mxu0 %vm1338_vm7, %v1284_v2 }
  0xcb   : > { %670 = vst.msk [vmem:[#allocation3 + $0x30] sm:$0xff] %vm663_vm3, %v628_v63  ;;  %v1283_v63 = vld [vmem:[%s2484_s3 + $0x18] sm:$0xff]  ;;  %1619 = vmatpush.msk.msra.mxu1 %vm1338_vm7, %v1284_v2 }
  0xcc   : > { %v626_v5 = vpop.permute.xlu0 %625  ;;  %1623 = vmatpush.msra.mxu2 %v1283_v63  ;;  %1624 = vmatpush.msra.mxu3 %v1283_v63 }
  0xcd   : > { %669 = vst.msk [vmem:[#allocation3 + $0x28] sm:$0xff] %vm663_vm3, %v626_v5  ;;  %1029 = vrot.lane.b32.xlu2 %v2061_v15, %s1731_s28  ;;  %v1282_v5 = vld [vmem:[%s2484_s3 + $0x10] sm:$0xff]  ;;  %1354 = vmatpush.msra.mxu0 %v1283_v63 }
  0xce   : > { %1626 = vmatpush.msra.mxu2 %v1282_v5  ;;  %1622 = vmatpush.msra.mxu1 %v1283_v63 }
  0xcf   : > { %v642_v10 = vpop.permute.xlu2 %641  ;;  %1627 = vmatpush.msra.mxu3 %v1282_v5  ;;  %1355 = vmatpush.msra.mxu0 %v1282_v5 }
  0xd0   : > { %907 = vrot.lane.b32.xlu1 %v1919_v42, %s1732_s29  ;;  %677 = vst.msk [vmem:[#allocation3 + $0x68] sm:$0xff] %vm663_vm3, %v642_v10  ;;  %v1084_v10 = vld [vmem:[#allocation2 + $0xd9] sm:$0xff]  ;;  %1625 = vmatpush.msra.mxu1 %v1282_v5 }
  0xd2   : > { %1223 = vrot.lane.b32.xlu0 %v2132_v8, %s1734_s6  ;;  %v634_v13 = vpop.permute.xlu1 %633 }
  0xd3   : > { %673 = vst.msk [vmem:[#allocation3 + $0x48] sm:$0xff] %vm663_vm3, %v634_v13 }
  0xd4   : > { %v632_v14 = vpop.permute.xlu0 %631 }
  0xd5   : > { %672 = vst.msk [vmem:[#allocation3 + $0x40] sm:$0xff] %vm663_vm3, %v632_v14  ;;  %1215 = vrot.lane.b32.xlu2 %v1966_v55, %s1734_s6  ;;  %v1280_v14 = vld [vmem:[%s2484_s3] sm:$0xff] }
  0xd7   : > { %v714_v42 = vpop.permute.xlu2 %713 }
  0xd8   : > { %1005 = vrot.lane.b32.xlu1 %v1925_v44, %s1731_s28  ;;  %762 = vst.msk [vmem:[#allocation3] sm:$0xff] %vm761_vm4, %v714_v42 }
  0xda   : > { %836 = vrot.lane.b32.xlu0 %v1908_v39, %s1730_s26  ;;  %v640_v15 = vpop.permute.xlu1 %639 }
  0xdb   : > { %676 = vst.msk [vmem:[#allocation3 + $0x60] sm:$0xff] %vm663_vm3, %v640_v15  ;;  %v449_v15 = vld [vmem:[%s2197_s13 + $0x10] sm:$0x3] }
  0xdc   : > { %v638_v16 = vpop.permute.xlu0 %637  ;;  %453 = vst.msk [vmem:[#allocation2 + $0xe8] sm:$0x3] %vm417_vm1, %v449_v15 }
  0xdd   : > { %675 = vst.msk [vmem:[#allocation3 + $0x58] sm:$0xff] %vm663_vm3, %v638_v16  ;;  %915 = vrot.lane.b32.xlu2 %v1929_v45, %s1732_s29 }
  0xdf   : > { %v720_v17 = vpop.permute.xlu2 %719 }
  0xe0   : > { %933 = vrot.lane.b32.xlu1 %v1988_v61, %s1732_s29  ;;  %765 = vst.msk [vmem:[#allocation3 + $0x18] sm:$0xff] %vm761_vm4, %v720_v17  ;;  %v1181_v17 = vld [vmem:[#allocation2 + $0xda] sm:$0xff] }
  0xe2   : > { %925 = vrot.lane.b32.xlu0 %v1970_v56, %s1732_s29  ;;  %v646_v44 = vpop.permute.xlu1 %645 }
  0xe3   : > { %679 = vst.msk [vmem:[#allocation3 + $0x78] sm:$0xff] %vm663_vm3, %v646_v44 }
  0xe4   : > { %v644_v18 = vpop.permute.xlu0 %643 }
  0xe5   : > { %678 = vst.msk [vmem:[#allocation3 + $0x70] sm:$0xff] %vm663_vm3, %v644_v18  ;;  %1013 = vrot.lane.b32.xlu2 %v2027_v6, %s1731_s28 }
  0xe7   : > { %v726_v20 = vpop.permute.xlu2 %725 }
  0xe8   : > { %1023 = vrot.lane.b32.xlu1 %v1983_v60, %s1731_s28  ;;  %768 = vst.msk [vmem:[#allocation3 + $0x30] sm:$0xff] %vm761_vm4, %v726_v20 }
  0xea   : > { %1110 = vrot.lane.b32.xlu0 %v1892_v34, %s1733_s30  ;;  %v718_v21 = vpop.permute.xlu1 %717 }
  0xeb   : > { %764 = vst.msk [vmem:[#allocation3 + $0x10] sm:$0xff] %vm761_vm4, %v718_v21 }
  0xec   : > { %v716_v23 = vpop.permute.xlu0 %715 }
  0xed   : > { %763 = vst.msk [vmem:[#allocation3 + $0x8] sm:$0xff] %vm761_vm4, %v716_v23  ;;  %1102 = vrot.lane.b32.xlu2 %v1863_v26, %s1733_s30  ;;  %v2182_v26 = vld [vmem:[#allocation2 + $0xc9] sm:$0xff] }
  0xef   : > { %v732_v6 = vpop.permute.xlu2 %731 }
  0xf0   : > { %1207 = vrot.lane.b32.xlu1 %v1950_v51, %s1734_s6  ;;  %771 = vst.msk [vmem:[#allocation3 + $0x48] sm:$0xff] %vm761_vm4, %v732_v6 }
  0xf2   : > { %1199 = vrot.lane.b32.xlu0 %v1940_v48, %s1734_s6  ;;  %v724_v34 = vpop.permute.xlu1 %723 }
  0xf3   : > { %767 = vst.msk [vmem:[#allocation3 + $0x28] sm:$0xff] %vm761_vm4, %v724_v34 }
  0xf4   : > { %v722_v60 = vpop.permute.xlu0 %721 }
  0xf5   : > { %766 = vst.msk [vmem:[#allocation3 + $0x20] sm:$0xff] %vm761_vm4, %v722_v60  ;;  %1031 = vrot.lane.b32.xlu2 %v2079_v22, %s1731_s28  ;;  %v1085_v60 = vld [vmem:[#allocation2 + $0xe1] sm:$0xff] }
  0xf7   : > { %v738_v24 = vpop.permute.xlu2 %737 }
  0xf8   : > { %1217 = vrot.lane.b32.xlu1 %v2008_v1, %s1734_s6  ;;  %774 = vst.msk [vmem:[#allocation3 + $0x60] sm:$0xff] %vm761_vm4, %v738_v24  ;;  %v1182_v24 = vld [vmem:[#allocation2 + $0xe2] sm:$0xff] }
  0xfa   : > { %1128 = vrot.lane.b32.xlu0 %v2182_v26, %s1733_s30  ;;  %v730_v11 = vpop.permute.xlu1 %729 }
  0xfb   : > { %770 = vst.msk [vmem:[#allocation3 + $0x40] sm:$0xff] %vm761_vm4, %v730_v11 }
  0xfc   : > { %v728_v19 = vpop.permute.xlu0 %727 }
  0xfd   : > { %769 = vst.msk [vmem:[#allocation3 + $0x38] sm:$0xff] %vm761_vm4, %v728_v19  ;;  %1120 = vrot.lane.b32.xlu2 %v1894_v35, %s1733_s30  ;;  %v1073_v19 = vld [vmem:[#allocation2 + $0x51] sm:$0xff] }
  0xff   : > { %v744_v22 = vpop.permute.xlu2 %743 }
 0x100   : > { %917 = vrot.lane.b32.xlu1 %v1960_v53, %s1732_s29  ;;  %777 = vst.msk [vmem:[#allocation3 + $0x78] sm:$0xff] %vm761_vm4, %v744_v22 }
 0x102   : > { %909 = vrot.lane.b32.xlu0 %v1915_v41, %s1732_s29  ;;  %v736_v33 = vpop.permute.xlu1 %735 }
 0x103   : > { %773 = vst.msk [vmem:[#allocation3 + $0x58] sm:$0xff] %vm761_vm4, %v736_v33 }
 0x104   : > { %v734_v43 = vpop.permute.xlu0 %733 }
 0x105   : > { %772 = vst.msk [vmem:[#allocation3 + $0x50] sm:$0xff] %vm761_vm4, %v734_v43  ;;  %1225 = vrot.lane.b32.xlu2 %v2206_v38, %s1734_s6 }
 0x107   : > { %v815_v47 = vpop.permute.xlu2 %814 }
 0x108   : > { %1007 = vrot.lane.b32.xlu1 %v2014_v3, %s1731_s28  ;;  %861 = vst.msk [vmem:[#allocation3 + $0x10] sm:$0xff] %vm858_vm5, %v815_v47 }
 0x10a   : > { %838 = vrot.lane.b32.xlu0 %v2119_v0, %s1730_s26  ;;  %v742_v41 = vpop.permute.xlu1 %741 }
 0x10b   : > { %776 = vst.msk [vmem:[#allocation3 + $0x70] sm:$0xff] %vm761_vm4, %v742_v41 }
 0x10c   : > { %v740_v59 = vpop.permute.xlu0 %739 }
 0x10d   : > { %775 = vst.msk [vmem:[#allocation3 + $0x68] sm:$0xff] %vm761_vm4, %v740_v59  ;;  %830 = vrot.lane.b32.xlu2 %v1898_v36, %s1730_s26 }
 0x10f   : > { %v821_v27 = vpop.permute.xlu2 %820 }
 0x110   : > { %935 = vrot.lane.b32.xlu1 %v2132_v8, %s1732_s29  ;;  %864 = vst.msk [vmem:[#allocation3 + $0x28] sm:$0xff] %vm858_vm5, %v821_v27  ;;  %v1281_v8 = vld [vmem:[%s2484_s3 + $0x8] sm:$0xff] }
 0x111   : > { %1629 = vmatpush.msra.mxu2 %v1281_v8  ;;  %1630 = vmatpush.msra.mxu3 %v1281_v8 }
 0x112   : > { %927 = vrot.lane.b32.xlu0 %v1966_v55, %s1732_s29  ;;  %v813_v3 = vpop.permute.xlu1 %812  ;;  %1356 = vmatpush.msra.mxu0 %v1281_v8 }
 0x113   : > { %860 = vst.msk [vmem:[#allocation3 + $0x8] sm:$0xff] %vm858_vm5, %v813_v3  ;;  %1632 = vmatpush.msra.mxu2 %v1280_v14  ;;  %1633 = vmatpush.msra.mxu3 %v1280_v14 }
 0x114   : > { %v811_v37 = vpop.permute.xlu0 %810  ;;  %1628 = vmatpush.msra.mxu1 %v1281_v8  ;;  %1357 = vmatpush.msra.mxu0 %v1280_v14 }
 0x115   : > { %859 = vst.msk [vmem:[#allocation3] sm:$0xff] %vm858_vm5, %v811_v37  ;;  %1015 = vrot.lane.b32.xlu2 %v1974_v57, %s1731_s28 }
 0x116   : > { %1631 = vmatpush.msra.mxu1 %v1280_v14 }
 0x117   : > { %v827_v0 = vpop.permute.xlu2 %826 }
 0x118   : > { %1025 = vrot.lane.b32.xlu1 %v2048_v9, %s1731_s28  ;;  %867 = vst.msk [vmem:[#allocation3 + $0x40] sm:$0xff] %vm858_vm5, %v827_v0  ;;  %v987_v9 = vld [vmem:[#allocation2 + $0xd8] sm:$0xff] }
 0x11a   : > { %1112 = vrot.lane.b32.xlu0 %v1884_v32, %s1733_s30  ;;  %v819_v36 = vpop.permute.xlu1 %818 }
 0x11b   : > { %863 = vst.msk [vmem:[#allocation3 + $0x20] sm:$0xff] %vm858_vm5, %v819_v36 }
 0x11c   : > { %v817_v55 = vpop.permute.xlu0 %816 }
 0x11d   : > { %862 = vst.msk [vmem:[#allocation3 + $0x18] sm:$0xff] %vm858_vm5, %v817_v55  ;;  %1104 = vrot.lane.b32.xlu2 %v1878_v30, %s1733_s30 }
 0x11f   : > { %v924_v57 = vpop.permute.xlu2 %923 }
 0x120   : > { %1209 = vrot.lane.b32.xlu1 %v1946_v50, %s1734_s6  ;;  %964 = vst.msk [vmem:[#allocation3 + $0x40] sm:$0xff] %vm955_vm6, %v924_v57 }
 0x122   : > { %1201 = vrot.lane.b32.xlu0 %v1932_v46, %s1734_s6  ;;  %v825_v32 = vpop.permute.xlu1 %824 }
 0x123   : > { %866 = vst.msk [vmem:[#allocation3 + $0x38] sm:$0xff] %vm858_vm5, %v825_v32 }
 0x124   : > { %v823_v30 = vpop.permute.xlu0 %822 }
 0x125   : > { %865 = vst.msk [vmem:[#allocation3 + $0x30] sm:$0xff] %vm858_vm5, %v823_v30  ;;  %1033 = vrot.lane.b32.xlu2 %v987_v9, %s1731_s28 }
 0x127   : > { %v1030_v12 = vpop.permute.xlu2 %1029 }
 0x128   : > { %1219 = vrot.lane.b32.xlu1 %v1997_v62, %s1734_s6 }
 0x12a   : > { %1130 = vrot.lane.b32.xlu0 %v1084_v10, %s1733_s30  ;;  %v835_v13 = vpop.permute.xlu1 %834 }
 0x12b   : > { %871 = vst.msk [vmem:[#allocation3 + $0x60] sm:$0xff] %vm858_vm5, %v835_v13 }
 0x12c   : > { %v829_v42 = vpop.permute.xlu0 %828 }
 0x12d   : > { %868 = vst.msk [vmem:[#allocation3 + $0x48] sm:$0xff] %vm858_vm5, %v829_v42  ;;  %1122 = vrot.lane.b32.xlu2 %v1913_v40, %s1733_s30 }
 0x12f   : > { %v1216_v62 = vpop.permute.xlu2 %1215 }
 0x130   : > { %919 = vrot.lane.b32.xlu1 %v1950_v51, %s1732_s29 }
 0x132   : > { %911 = vrot.lane.b32.xlu0 %v1940_v48, %s1732_s29  ;;  %v1022_v16 = vpop.permute.xlu1 %1021 }
 0x133   : > { %1062 = vst.msk [vmem:[#allocation3 + $0x40] sm:$0xff] %vm1053_vm8, %v1022_v16 }
 0x134   : > { %v932_v44 = vpop.permute.xlu0 %931 }
 0x135   : > { %968 = vst.msk [vmem:[#allocation3 + $0x60] sm:$0xff] %vm955_vm6, %v932_v44  ;;  %1227 = vrot.lane.b32.xlu2 %v1181_v17, %s1734_s6 }
 0x136   : > { %1066 = vst.msk [vmem:[#allocation3 + $0x60] sm:$0xff] %vm1053_vm8, %v1030_v12 }
 0x137   : > { %v916_v40 = vpop.permute.xlu2 %915 }
 0x138   : > { %1009 = vrot.lane.b32.xlu1 %v1954_v52, %s1731_s28  ;;  %960 = vst.msk [vmem:[#allocation3 + $0x20] sm:$0xff] %vm955_vm6, %v916_v40 }
 0x13a   : > { %840 = vrot.lane.b32.xlu0 %v2182_v26, %s1730_s26  ;;  %v1127_v48 = vpop.permute.xlu1 %1126 }
 0x13b   : > { %1163 = vst.msk [vmem:[#allocation3 + $0x60] sm:$0xff] %vm1150_vm9, %v1127_v48 }
 0x13c   : > { %v1119_v51 = vpop.permute.xlu0 %1118 }
 0x13d   : > { %1159 = vst.msk [vmem:[#allocation3 + $0x40] sm:$0xff] %vm1150_vm9, %v1119_v51  ;;  %832 = vrot.lane.b32.xlu2 %v1894_v35, %s1730_s26  ;;  %s1597_s26 = sshll.u32 %s2504_s25, 1 }
 0x13e   : > { %1256 = vst.msk [vmem:[#allocation3 + $0x40] sm:$0xff] %vm1247_vm10, %v1216_v62 }
 0x13f   : > { %v1014_v18 = vpop.permute.xlu2 %1013 }
 0x140   : > { %937 = vrot.lane.b32.xlu1 %v2206_v38, %s1732_s29  ;;  %1058 = vst.msk [vmem:[#allocation3 + $0x20] sm:$0xff] %vm1053_vm8, %v1014_v18  ;;  %v1077_v38 = vld [vmem:[#allocation2 + $0x81] sm:$0xff] }
 0x142   : > { %929 = vrot.lane.b32.xlu0 %v2008_v1, %s1732_s29  ;;  %v908_v52 = vpop.permute.xlu1 %907 }
 0x143   : > { %956 = vst.msk [vmem:[#allocation3] sm:$0xff] %vm955_vm6, %v908_v52  ;;  %v2394_v52 = vld [vmem:[%s2485_s4] ss:$0 sm:$0xff] }
 0x144   : > { %v1224_v20 = vpop.permute.xlu0 %1223 }
 0x145   : > { %1260 = vst.msk [vmem:[#allocation3 + $0x60] sm:$0xff] %vm1247_vm10, %v1224_v20  ;;  %v1272_v21 = vld [vmem:[#allocation3 + $0x40] sm:$0xff]  ;;  %1017 = vrot.lane.b32.xlu2 %v1962_v54, %s1731_s28 }
 0x146   : > { %1609 = vmatmul.msk.f32.vlgmr.msra.gmra.mxu2 %vm1289_vm11, %v1272_v21 }
 0x147   : > { %v1103_v35 = vpop.permute.xlu2 %1102 }
 0x148   : > { %1027 = vrot.lane.b32.xlu1 %v2020_v4, %s1731_s28  ;;  %v988_v4 = vld [vmem:[#allocation2 + $0xe0] sm:$0xff] }
 0x14a   : > { %1114 = vrot.lane.b32.xlu0 %v1880_v31, %s1733_s30  ;;  %v1006_v1 = vpop.permute.xlu1 %1005 }
 0x14b   : > { %1054 = vst.msk [vmem:[#allocation3] sm:$0xff] %vm1053_vm8, %v1006_v1 }
 0x14c   : > { %v837_v23 = vpop.permute.xlu0 %836  ;;  %v1276_v6 = vld [vmem:[#allocation3 + $0x60] sm:$0xff]  ;;  %1151 = vst.msk [vmem:[#allocation3] sm:$0xff] %vm1150_vm9, %v1103_v35 }
 0x14d   : > { %872 = vst.msk [vmem:[#allocation3 + $0x68] sm:$0xff] %vm858_vm5, %v837_v23  ;;  %1613 = vmatmul.msk.f32.vlgmr.msra.gmra.mxu3 %vm1289_vm11, %v1276_v6  ;;  %1106 = vrot.lane.b32.xlu2 %v1870_v28, %s1733_s30 }
 0x14f   : > { %v1032_v54 = vpop.permute.xlu2 %1031 }
 0x150   : > { %1211 = vrot.lane.b32.xlu1 %v1981_v58, %s1734_s6 }
 0x152   : > { %1203 = vrot.lane.b32.xlu0 %v1929_v45, %s1734_s6  ;;  %v934_v31 = vpop.permute.xlu1 %933 }
 0x153   : > { %969 = vst.msk [vmem:[#allocation3 + $0x68] sm:$0xff] %vm955_vm6, %v934_v31 }
 0x154   : > { %v926_v34 = vpop.permute.xlu0 %925  ;;  %1067 = vst.msk [vmem:[#allocation3 + $0x68] sm:$0xff] %vm1053_vm8, %v1032_v54 }
 0x155   : > { %965 = vst.msk [vmem:[#allocation3 + $0x48] sm:$0xff] %vm955_vm6, %v926_v34  ;;  %1035 = vrot.lane.b32.xlu2 %v988_v4, %s1731_s28 }
 0x157   : > { %v1121_v28 = vpop.permute.xlu2 %1120 }
 0x158   : > { %1221 = vrot.lane.b32.xlu1 %v1988_v61, %s1734_s6 }
 0x15a   : > { %1132 = vrot.lane.b32.xlu0 %v1085_v60, %s1733_s30  ;;  %v1024_v58 = vpop.permute.xlu1 %1023 }
 0x15b   : > { %1063 = vst.msk [vmem:[#allocation3 + $0x48] sm:$0xff] %vm1053_vm8, %v1024_v58 }
 0x15c   : > { %v1111_v45 = vpop.permute.xlu0 %1110  ;;  %1160 = vst.msk [vmem:[#allocation3 + $0x48] sm:$0xff] %vm1150_vm9, %v1121_v28 }
 0x15d   : > { %1155 = vst.msk [vmem:[#allocation3 + $0x20] sm:$0xff] %vm1150_vm9, %v1111_v45  ;;  %1124 = vrot.lane.b32.xlu2 %v1908_v39, %s1733_s30 }
 0x15f   : > { %v1226_v26 = vpop.permute.xlu2 %1225 }
 0x160   : > { %921 = vrot.lane.b32.xlu1 %v1946_v50, %s1732_s29 }
 0x162   : > { %913 = vrot.lane.b32.xlu0 %v1932_v46, %s1732_s29  ;;  %v1208_v61 = vpop.permute.xlu1 %1207 }
 0x163   : > { %1252 = vst.msk [vmem:[#allocation3 + $0x20] sm:$0xff] %vm1247_vm10, %v1208_v61 }
 0x164   : > { %v1200_v11 = vpop.permute.xlu0 %1199 }
 0x165   : > { %1248 = vst.msk [vmem:[#allocation3] sm:$0xff] %vm1247_vm10, %v1200_v11  ;;  %1229 = vrot.lane.b32.xlu2 %v1182_v24, %s1734_s6 }
 0x167   : > { %v831_v22 = vpop.permute.xlu2 %830 }
 0x168   : > { %1108 = vrot.lane.b32.xlu1 %v1073_v19, %s1733_s30  ;;  %869 = vst.msk [vmem:[#allocation3 + $0x50] sm:$0xff] %vm858_vm5, %v831_v22 }
 0x16a   : > { %1019 = vrot.lane.b32.xlu0 %v2037_v7, %s1731_s28  ;;  %v1218_v39 = vpop.permute.xlu1 %1217  ;;  %v1268_v46 = vld [vmem:[#allocation3 + $0x20] sm:$0xff] }
 0x16b   : > { %1257 = vst.msk [vmem:[#allocation3 + $0x48] sm:$0xff] %vm1247_vm10, %v1218_v39  ;;  %1605 = vmatmul.msk.f32.vlgmr.msra.gmra.mxu1 %vm1289_vm11, %v1268_v46 }
 0x16c   : > { %v1129_v50 = vpop.permute.xlu0 %1128  ;;  %v1264_v25 = vld [vmem:[#allocation3] sm:$0xff] }
 0x16d   : > { %1164 = vst.msk [vmem:[#allocation3 + $0x68] sm:$0xff] %vm1150_vm9, %v1129_v50  ;;  %1601 = vmatmul.msk.f32.vlgmr.msra.gmra.mxu0 %vm1289_vm11, %v1264_v25  ;;  %1011 = vrot.lane.b32.xlu2 %v1942_v49, %s1731_s28  ;;  %s1598_s28 = sshll.u32 %s2498_s19, 5 }
 0x16e   : > { %1261 = vst.msk [vmem:[#allocation3 + $0x68] sm:$0xff] %vm1247_vm10, %v1226_v26  ;;  %s386_s29 = sadd.s32 %s1598_s28, %s1597_s26 }
 0x16f   : > { %v1016_v29 = vpop.permute.xlu2 %1015  ;;  %s1599_s11 = sshll.u32 %s386_s29, 3 }
 0x170   : > { %1213 = vrot.lane.b32.xlu1 %v1970_v56, %s1734_s6  ;;  %s2402_s12 = scalar_lea.vmem %s2486_s5, %s1599_s11 }
 0x172   : > { %1205 = vrot.lane.b32.xlu0 %v1960_v53, %s1734_s6  ;;  %v918_v7 = vpop.permute.xlu1 %917  ;;  %v1273_v33 = vld [vmem:[#allocation3 + $0x48] sm:$0xff] }
 0x173   : > { %961 = vst.msk [vmem:[#allocation3 + $0x28] sm:$0xff] %vm955_vm6, %v918_v7  ;;  %1610 = vmatmul.msk.f32.gmra.mxu2 %vm1289_vm11, %v1273_v33 }
 0x174   : > { %v910_v43 = vpop.permute.xlu0 %909  ;;  %1059 = vst.msk [vmem:[#allocation3 + $0x28] sm:$0xff] %vm1053_vm8, %v1016_v29 }
 0x175   : > { %957 = vst.msk [vmem:[#allocation3 + $0x8] sm:$0xff] %vm955_vm6, %v910_v43  ;;  %v1277_v49 = vld [vmem:[#allocation3 + $0x68] sm:$0xff]  ;;  %1116 = vrot.lane.b32.xlu2 %v1077_v38, %s1733_s30 }
 0x176   : > { %1614 = vmatmul.msk.f32.gmra.mxu3 %vm1289_vm11, %v1277_v49 }
 0x177   : > { %v1105_v56 = vpop.permute.xlu2 %1104 }
 0x17a   : > { %v1008_v47 = vpop.permute.xlu1 %1007 }
 0x17b   : > { %1055 = vst.msk [vmem:[#allocation3 + $0x8] sm:$0xff] %vm1053_vm8, %v1008_v47 }
 0x17c   : > { %v839_v53 = vpop.permute.xlu0 %838  ;;  %1152 = vst.msk [vmem:[#allocation3 + $0x8] sm:$0xff] %vm1150_vm9, %v1105_v56 }
 0x17d   : > { %873 = vst.msk [vmem:[#allocation3 + $0x70] sm:$0xff] %vm858_vm5, %v839_v53 }
 0x17f   : > { %v1034_v41 = vpop.permute.xlu2 %1033 }
 0x182   : > { %v936_v59 = vpop.permute.xlu1 %935 }
 0x183   : > { %970 = vst.msk [vmem:[#allocation3 + $0x70] sm:$0xff] %vm955_vm6, %v936_v59 }
 0x184   : > { %v928_v27 = vpop.permute.xlu0 %927  ;;  %1068 = vst.msk [vmem:[#allocation3 + $0x70] sm:$0xff] %vm1053_vm8, %v1034_v41 }
 0x185   : > { %966 = vst.msk [vmem:[#allocation3 + $0x50] sm:$0xff] %vm955_vm6, %v928_v27 }
 0x187   : > { %v1123_v3 = vpop.permute.xlu2 %1122 }
 0x18a   : > { %v1026_v37 = vpop.permute.xlu1 %1025 }
 0x18b   : > { %1064 = vst.msk [vmem:[#allocation3 + $0x50] sm:$0xff] %vm1053_vm8, %v1026_v37 }
 0x18c   : > { %v1113_v0 = vpop.permute.xlu0 %1112  ;;  %1161 = vst.msk [vmem:[#allocation3 + $0x50] sm:$0xff] %vm1150_vm9, %v1123_v3 }
 0x18d   : > { %1156 = vst.msk [vmem:[#allocation3 + $0x28] sm:$0xff] %vm1150_vm9, %v1113_v0 }
 0x18f   : > { %v1228_v36 = vpop.permute.xlu2 %1227 }
 0x192   : > { %v1210_v55 = vpop.permute.xlu1 %1209 }
 0x193   : > { %1253 = vst.msk [vmem:[#allocation3 + $0x28] sm:$0xff] %vm1247_vm10, %v1210_v55 }
 0x194   : > { %v1202_v57 = vpop.permute.xlu0 %1201 }
 0x195   : > { %1249 = vst.msk [vmem:[#allocation3 + $0x8] sm:$0xff] %vm1247_vm10, %v1202_v57 }
 0x197   : > { %v833_v32 = vpop.permute.xlu2 %832 }
 0x198   : > { %870 = vst.msk [vmem:[#allocation3 + $0x58] sm:$0xff] %vm858_vm5, %v833_v32 }
 0x19a   : > { %v1220_v9 = vpop.permute.xlu1 %1219  ;;  %v1269_v2 = vld [vmem:[#allocation3 + $0x28] sm:$0xff] }
 0x19b   : > { %1258 = vst.msk [vmem:[#allocation3 + $0x50] sm:$0xff] %vm1247_vm10, %v1220_v9  ;;  %1606 = vmatmul.msk.f32.gmra.mxu1 %vm1289_vm11, %v1269_v2 }
 0x19c   : > { %v1131_v30 = vpop.permute.xlu0 %1130  ;;  %v1265_v63 = vld [vmem:[#allocation3 + $0x8] sm:$0xff] }
 0x19d   : > { %1165 = vst.msk [vmem:[#allocation3 + $0x70] sm:$0xff] %vm1150_vm9, %v1131_v30  ;;  %1602 = vmatmul.msk.f32.gmra.mxu0 %vm1289_vm11, %v1265_v63 }
 0x19e   : > { %1262 = vst.msk [vmem:[#allocation3 + $0x70] sm:$0xff] %vm1247_vm10, %v1228_v36 }
 0x19f   : > { %v1018_v5 = vpop.permute.xlu2 %1017 }
 0x1a2   : > { %v920_v8 = vpop.permute.xlu1 %919  ;;  %v1274_v10 = vld [vmem:[#allocation3 + $0x50] sm:$0xff] }
 0x1a3   : > { %962 = vst.msk [vmem:[#allocation3 + $0x30] sm:$0xff] %vm955_vm6, %v920_v8  ;;  %1611 = vmatmul.msk.f32.gmra.mxu2 %vm1289_vm11, %v1274_v10 }
 0x1a4   : > { %v912_v12 = vpop.permute.xlu0 %911  ;;  %1060 = vst.msk [vmem:[#allocation3 + $0x30] sm:$0xff] %vm1053_vm8, %v1018_v5 }
 0x1a5   : > { %958 = vst.msk [vmem:[#allocation3 + $0x10] sm:$0xff] %vm955_vm6, %v912_v12  ;;  %v1278_v13 = vld [vmem:[#allocation3 + $0x70] sm:$0xff] }
 0x1a6   : > { %1615 = vmatmul.msk.f32.gmra.mxu3 %vm1289_vm11, %v1278_v13 }
 0x1a7   : > { %v1107_v14 = vpop.permute.xlu2 %1106 }
 0x1aa   : > { %v1010_v42 = vpop.permute.xlu1 %1009 }
 0x1ab   : > { %1056 = vst.msk [vmem:[#allocation3 + $0x10] sm:$0xff] %vm1053_vm8, %v1010_v42 }
 0x1ac   : > { %v841_v62 = vpop.permute.xlu0 %840  ;;  %1153 = vst.msk [vmem:[#allocation3 + $0x10] sm:$0xff] %vm1150_vm9, %v1107_v14 }
 0x1ad   : > { %874 = vst.msk [vmem:[#allocation3 + $0x78] sm:$0xff] %vm858_vm5, %v841_v62 }
 0x1af   : > { %v1036_v15 = vpop.permute.xlu2 %1035 }
 0x1b2   : > { %v938_v16 = vpop.permute.xlu1 %937 }
 0x1b3   : > { %971 = vst.msk [vmem:[#allocation3 + $0x78] sm:$0xff] %vm955_vm6, %v938_v16 }
 0x1b4   : > { %v930_v17 = vpop.permute.xlu0 %929  ;;  %1069 = vst.msk [vmem:[#allocation3 + $0x78] sm:$0xff] %vm1053_vm8, %v1036_v15 }
 0x1b5   : > { %967 = vst.msk [vmem:[#allocation3 + $0x58] sm:$0xff] %vm955_vm6, %v930_v17 }
 0x1b7   : > { %v1125_v44 = vpop.permute.xlu2 %1124 }
 0x1ba   : > { %v1028_v40 = vpop.permute.xlu1 %1027 }
 0x1bb   : > { %1065 = vst.msk [vmem:[#allocation3 + $0x58] sm:$0xff] %vm1053_vm8, %v1028_v40 }
 0x1bc   : > { %v1115_v48 = vpop.permute.xlu0 %1114  ;;  %1162 = vst.msk [vmem:[#allocation3 + $0x58] sm:$0xff] %vm1150_vm9, %v1125_v44 }
 0x1bd   : > { %1157 = vst.msk [vmem:[#allocation3 + $0x30] sm:$0xff] %vm1150_vm9, %v1115_v48 }
 0x1bf   : > { %v1230_v20 = vpop.permute.xlu2 %1229 }
 0x1c2   : > { %v1212_v51 = vpop.permute.xlu1 %1211 }
 0x1c3   : > { %1254 = vst.msk [vmem:[#allocation3 + $0x30] sm:$0xff] %vm1247_vm10, %v1212_v51 }
 0x1c4   : > { %v1204_v18 = vpop.permute.xlu0 %1203 }
 0x1c5   : > { %1250 = vst.msk [vmem:[#allocation3 + $0x10] sm:$0xff] %vm1247_vm10, %v1204_v18 }
 0x1c7   : > { %v1012_v60 = vpop.permute.xlu2 %1011 }
 0x1c9   : > { %v1383_v21 = vpop.f32.mrf.mxu2 }
 0x1ca   : > { %v1222_v35 = vpop.permute.xlu1 %1221  ;;  %v1270_v1 = vld [vmem:[#allocation3 + $0x30] sm:$0xff]  ;;  %v1384_v23 = vadd.f32 %v2394_v52, %v1383_v21 }
 0x1cb   : > { %1259 = vst.msk [vmem:[#allocation3 + $0x58] sm:$0xff] %vm1247_vm10, %v1222_v35  ;;  %1607 = vmatmul.msk.f32.gmra.mxu1 %vm1289_vm11, %v1270_v1 }
 0x1cc   : > { %v1133_v6 = vpop.permute.xlu0 %1132  ;;  %v1266_v54 = vld [vmem:[#allocation3 + $0x10] sm:$0xff]  ;;  %v1415_v31 = vmax.f32 %v1384_v23, 0.0 }
 0x1cd   : > { %1166 = vst.msk [vmem:[#allocation3 + $0x78] sm:$0xff] %vm1150_vm9, %v1133_v6  ;;  %1603 = vmatmul.msk.f32.gmra.mxu0 %vm1289_vm11, %v1266_v54 }
 0x1ce   : > { %1432 = vst.msk [vmem:[%s2402_s12 + $0x40] sm:$0xff] %vm1423_vm12, %v1415_v31 }
 0x1cf   : > { %1263 = vst.msk [vmem:[#allocation3 + $0x78] sm:$0xff] %vm1247_vm10, %v1230_v20  ;;  %v1117_v11 = vpop.permute.xlu2 %1116 }
 0x1d0   : > { %v1395_v4 = vpop.f32.mrf.mxu3 }
 0x1d1   : > { %v1396_v34 = vadd.f32 %v2394_v52, %v1395_v4 }
 0x1d2   : > { %v922_v28 = vpop.permute.xlu1 %921  ;;  %v1275_v58 = vld [vmem:[#allocation3 + $0x58] sm:$0xff] }
 0x1d3   : > { %v1419_v45 = vmax.f32 %v1396_v34, 0.0  ;;  %963 = vst.msk [vmem:[#allocation3 + $0x38] sm:$0xff] %vm955_vm6, %v922_v28  ;;  %1612 = vmatmul.msk.f32.gmra.mxu2 %vm1289_vm11, %v1275_v58 }
 0x1d4   : > { %v914_v26 = vpop.permute.xlu0 %913 }
 0x1d5   : > { %1436 = vst.msk [vmem:[%s2402_s12 + $0x60] sm:$0xff] %vm1423_vm12, %v1419_v45 }
 0x1d6   : > { %959 = vst.msk [vmem:[#allocation3 + $0x18] sm:$0xff] %vm955_vm6, %v914_v26  ;;  %v1279_v61 = vld [vmem:[#allocation3 + $0x78] sm:$0xff] }
 0x1d7   : > { %1057 = vst.msk [vmem:[#allocation3 + $0x18] sm:$0xff] %vm1053_vm8, %v1012_v60  ;;  %1616 = vmatmul.msk.f32.gmra.mxu3 %vm1289_vm11, %v1279_v61 }
 0x1da   : > { %v1109_v24 = vpop.permute.xlu1 %1108 }
 0x1db   : > { %1154 = vst.msk [vmem:[#allocation3 + $0x18] sm:$0xff] %vm1150_vm9, %v1109_v24 }
 0x1dc   : > { %v1020_v19 = vpop.permute.xlu0 %1019 }
 0x1dd   : > { %1061 = vst.msk [vmem:[#allocation3 + $0x38] sm:$0xff] %vm1053_vm8, %v1020_v19 }
 0x1de   : > { %1158 = vst.msk [vmem:[#allocation3 + $0x38] sm:$0xff] %vm1150_vm9, %v1117_v11 }
 0x1e2   : > { %v1214_v22 = vpop.permute.xlu1 %1213 }
 0x1e3   : > { %1255 = vst.msk [vmem:[#allocation3 + $0x38] sm:$0xff] %vm1247_vm10, %v1214_v22 }
 0x1e4   : > { %v1206_v39 = vpop.permute.xlu0 %1205 }
 0x1e5   : > { %1251 = vst.msk [vmem:[#allocation3 + $0x18] sm:$0xff] %vm1247_vm10, %v1206_v39 }
 0x1e8   : > { %v1371_v46 = vpop.f32.mrf.mxu1 }
 0x1e9   : > { %v1372_v50 = vadd.f32 %v2394_v52, %v1371_v46 }
 0x1ea   : > { %v1359_v25 = vpop.f32.mrf.mxu0  ;;  %v1271_v29 = vld [vmem:[#allocation3 + $0x38] sm:$0xff] }
 0x1eb   : > { %v1360_v7 = vadd.f32 %v2394_v52, %v1359_v25  ;;  %v1411_v33 = vmax.f32 %v1372_v50, 0.0  ;;  %1608 = vmatmul.msk.f32.gmra.mxu1 %vm1289_vm11, %v1271_v29 }
 0x1ec   : > { %v1267_v38 = vld [vmem:[#allocation3 + $0x18] sm:$0xff] }
 0x1ed   : > { %v1407_v43 = vmax.f32 %v1360_v7, 0.0  ;;  %1428 = vst.msk [vmem:[%s2402_s12 + $0x20] sm:$0xff] %vm1423_vm12, %v1411_v33  ;;  %1604 = vmatmul.msk.f32.gmra.mxu0 %vm1289_vm11, %v1267_v38 }
 0x1ef   : > { %1424 = vst.msk [vmem:[%s2402_s12] sm:$0xff] %vm1423_vm12, %v1407_v43 }
 0x1f6   : > { %v1386_v49 = vpop.f32.mrf.mxu2 }
 0x1f7   : > { %v1387_v56 = vadd.f32 %v2394_v52, %v1386_v49 }
 0x1f9   : > { %v1416_v47 = vmax.f32 %v1387_v56, 0.0  ;;  %v1398_v53 = vpop.f32.mrf.mxu3 }
 0x1fa   : > { %v1399_v41 = vadd.f32 %v2394_v52, %v1398_v53 }
 0x1fb   : > { %1433 = vst.msk [vmem:[%s2402_s12 + $0x48] sm:$0xff] %vm1423_vm12, %v1416_v47 }
 0x1fc   : > { %v1420_v59 = vmax.f32 %v1399_v41, 0.0 }
 0x1fe   : > { %1437 = vst.msk [vmem:[%s2402_s12 + $0x68] sm:$0xff] %vm1423_vm12, %v1420_v59 }
 0x218   : > { %v1374_v27 = vpop.f32.mrf.mxu1 }
 0x219   : > { %v1375_v3 = vadd.f32 %v2394_v52, %v1374_v27 }
 0x21a   : > { %v1362_v37 = vpop.f32.mrf.mxu0 }
 0x21b   : > { %v1363_v0 = vadd.f32 %v2394_v52, %v1362_v37  ;;  %v1412_v36 = vmax.f32 %v1375_v3, 0.0 }
 0x21d   : > { %v1408_v55 = vmax.f32 %v1363_v0, 0.0  ;;  %1429 = vst.msk [vmem:[%s2402_s12 + $0x28] sm:$0xff] %vm1423_vm12, %v1412_v36 }
 0x21f   : > { %1425 = vst.msk [vmem:[%s2402_s12 + $0x8] sm:$0xff] %vm1423_vm12, %v1408_v55 }
 0x226   : > { %v1389_v57 = vpop.f32.mrf.mxu2 }
 0x227   : > { %v1390_v32 = vadd.f32 %v2394_v52, %v1389_v57 }
 0x229   : > { %v1417_v9 = vmax.f32 %v1390_v32, 0.0  ;;  %v1401_v2 = vpop.f32.mrf.mxu3 }
 0x22a   : > { %v1402_v30 = vadd.f32 %v2394_v52, %v1401_v2 }
 0x22b   : > { %1434 = vst.msk [vmem:[%s2402_s12 + $0x50] sm:$0xff] %vm1423_vm12, %v1417_v9 }
 0x22c   : > { %v1421_v63 = vmax.f32 %v1402_v30, 0.0 }
 0x22e   : > { %1438 = vst.msk [vmem:[%s2402_s12 + $0x70] sm:$0xff] %vm1423_vm12, %v1421_v63 }
 0x248   : > { %v1377_v5 = vpop.f32.mrf.mxu1 }
 0x249   : > { %v1378_v8 = vadd.f32 %v2394_v52, %v1377_v5 }
 0x24a   : > { %v1365_v10 = vpop.f32.mrf.mxu0 }
 0x24b   : > { %v1366_v12 = vadd.f32 %v2394_v52, %v1365_v10  ;;  %v1413_v13 = vmax.f32 %v1378_v8, 0.0 }
 0x24d   : > { %v1409_v14 = vmax.f32 %v1366_v12, 0.0  ;;  %1430 = vst.msk [vmem:[%s2402_s12 + $0x30] sm:$0xff] %vm1423_vm12, %v1413_v13 }
 0x24f   : > { %1426 = vst.msk [vmem:[%s2402_s12 + $0x10] sm:$0xff] %vm1423_vm12, %v1409_v14 }
 0x256   : > { %v1392_v42 = vpop.f32.mrf.mxu2 }
 0x257   : > { %v1393_v62 = vadd.f32 %v2394_v52, %v1392_v42 }
 0x259   : > { %v1418_v15 = vmax.f32 %v1393_v62, 0.0 }
 0x25a   : > { %v1404_v16 = vpop.f32.mrf.mxu3 }
 0x25b   : > { %1435 = vst.msk [vmem:[%s2402_s12 + $0x58] sm:$0xff] %vm1423_vm12, %v1418_v15  ;;  %v1405_v17 = vadd.f32 %v2394_v52, %v1404_v16 }
 0x25d   : > { %v1422_v44 = vmax.f32 %v1405_v17, 0.0 }
 0x25f   : > { %1439 = vst.msk [vmem:[%s2402_s12 + $0x78] sm:$0xff] %vm1423_vm12, %v1422_v44 }
 0x268   : > { %v1380_v40 = vpop.f32.mrf.mxu1 }
 0x269   : > { %v1381_v48 = vadd.f32 %v2394_v52, %v1380_v40 }
 0x26a   : > { %v1368_v51 = vpop.f32.mrf.mxu0 }
 0x26b   : > { %v1369_v18 = vadd.f32 %v2394_v52, %v1368_v51  ;;  %v1414_v20 = vmax.f32 %v1381_v48, 0.0 }
 0x26d   : > { %v1410_v21 = vmax.f32 %v1369_v18, 0.0  ;;  %1431 = vst.msk [vmem:[%s2402_s12 + $0x38] sm:$0xff] %vm1423_vm12, %v1414_v20 }
 0x26f   : > { %1427 = vst.msk [vmem:[%s2402_s12 + $0x18] sm:$0xff] %vm1423_vm12, %v1410_v21 }
 0x270 PF: > { %s15_s22 = sadd.s32 1, %s1725_s22   ;;  %s2487_s18 = smov %s1717_s20 }
 0x271   : > { %p12_p10 = scmp.ge.s32.totalorder %s15_s22, 6   ;;  %s2488_s19 = smov %s1721_s21 }
 0x272   : > { %s2489_s20 = smov %s2492_s23  ;;  %s2490_s21 = smov %s2496_s24 }
 0x273   :  { %14 = sbr.rel (!%p12_p10) target bundleno = 3 (0x3), region = 80 }

</bundles_post_ra>
